<compile_context>
chip_gen: v5e
topology: v5e:2x2
jax: 0.10.0
libtpu: 0.0.40
codegen_flags: <defaults>
</compile_context>

<pallas_src>
import jax
import jax.numpy as jnp
from jax.experimental import pallas as pl
from jax.experimental.pallas import tpu as pltpu

MATMUL_DTYPE = jnp.bfloat16      # MXU operand dtype (accumulation stays f32)
GELU_APPROXIMATE = True          # tanh GELU (EUP) per perf review; False = exact erf
_LN_EPS = 1e-5                   # torch.nn.LayerNorm default eps
_SQRT_2_OVER_PI = 0.7978845608028654
_INV_SQRT_2 = 0.7071067811865476


def _layernorm(x, gamma, beta):
    # Fused single-pass LayerNorm: var = E[x^2] - E[x]^2 (one sweep over lanes).
    mu = jnp.mean(x, axis=-1, keepdims=True)
    ms = jnp.mean(x * x, axis=-1, keepdims=True)
    var = jnp.maximum(ms - mu * mu, 0.0)
    return (x - mu) * jax.lax.rsqrt(var + _LN_EPS) * gamma + beta


def _gelu(x):
    if GELU_APPROXIMATE:
        # tanh-approximate GELU: single EUP push instead of a long erf VALU
        # polynomial (== torch.nn.GELU(approximate='tanh')).
        return 0.5 * x * (1.0 + jnp.tanh(_SQRT_2_OVER_PI * (x + 0.044715 * (x * x * x))))
    # exact erf GELU (torch.nn.GELU() default)
    return 0.5 * x * (1.0 + jax.lax.erf(x * _INV_SQRT_2))


def mixer_kernel(x_ref, ln_ref, w1p_ref, w2p_ref, pb_ref,
                 w1c_ref, w2c_ref, cb_ref, o_ref, x1_ref):
    TB, L, D = x_ref.shape
    f32 = jnp.float32
    mm = w1p_ref.dtype                                  # matmul operand dtype

    x = x_ref[...].astype(f32)                          # (TB, L, D)

    ln = ln_ref[...]                                    # (4, D) f32
    g1, b1 = ln[0:1, :], ln[1:2, :]
    g2, b2 = ln[2:3, :], ln[3:4, :]
    pb = pb_ref[...]                                    # (L, 2) f32
    bp1, bp2 = pb[:, 0:1], pb[:, 1:2]                   # (L, 1)
    cbias = cb_ref[...]                                 # (2, D) f32
    bc1, bc2 = cbias[0:1, :], cbias[1:2, :]             # (1, D)
    w1p, w2p = w1p_ref[...], w2p_ref[...]               # (L, L)
    w1c, w2c = w1c_ref[...], w2c_ref[...]               # (D, D), pre-transposed

    # ---- token (patch) mixing ------------------------------------------
    #   W2p @ gelu(W1p @ y + bp1) + bp2   (== transpose->Linear->transpose)
    # Unrolled over the small static batch tile: TB plain 2-D MXU matmuls,
    # no broadcast-materialized weight copies, no relayouts (D stays on lane).
    y = _layernorm(x, g1, b1)                           # (TB, L, D) f32
    for b in range(TB):
        h = jnp.dot(w1p, y[b].astype(mm), preferred_element_type=f32) + bp1
        h = _gelu(h)
        h = jnp.dot(w2p, h.astype(mm), preferred_element_type=f32) + bp2
        # residual add, written into the flat (TB*L, D) f32 scratch
        x1_ref[pl.ds(b * L, L), :] = h + x[b]

    # ---- channel mixing: ONE wide (TB*L, D) x (D, D) matmul per step ----
    x1 = x1_ref[...]                                    # (TB*L, D) f32
    z = _layernorm(x1, g2, b2)
    c = jnp.dot(z.astype(mm), w1c, preferred_element_type=f32) + bc1
    c = _gelu(c)
    c = jnp.dot(c.astype(mm), w2c, preferred_element_type=f32) + bc2
    out = c + x1                                        # (TB*L, D) f32

    if L % 8 == 0:
        # free view: the collapsed sublane dim splits on an 8-aligned boundary
        o_ref[...] = out.reshape(TB, L, D).astype(o_ref.dtype)
    else:
        # avoid a full-slab relayout for non-8-aligned L: per-batch stores
        for b in range(TB):
            o_ref[b] = out[b * L:(b + 1) * L].astype(o_ref.dtype)


# ----------------------------------------------------------------------------
# Host-side sizing / wrapper
# ----------------------------------------------------------------------------

def _per_batch_vmem_bytes(L, D):
    # Tightened per-batch-element footprint (perf review):
    #   2x f32 input block + 2x f32 output block (double-buffered)      = 4x
    #   f32 intermediates: x, y, x1-scratch, z, c, out                  ~ 6x
    #   bf16 cast temporaries of y/h/z/c (f32-equivalent)               ~ 2x
    #   slack for spills / small temporaries                            ~ 2x
    return 14 * L * D * 4


def _tpu_vmem_capacity_bytes():
    cap = 64 << 20                       # conservative default: v7x = 64 MiB/TC
    try:
        cap = int(pltpu.get_tpu_info().vmem_capacity_bytes)
    except Exception:
        pass
    return max(cap, 64 << 20)


def _choose_batch_tile(B, L, D, *, act_budget_bytes, max_unroll=8):
    per_b = _per_batch_vmem_bytes(L, D)
    tb_cap = max(1, act_budget_bytes // per_b)
    # keep >=4 grid steps when the batch allows it: cross-step DMA/compute
    # overlap and megacore ("parallel") sharding across v7x's 2 TensorCores.
    tb_cap = min(tb_cap, max(1, B // 4))
    # the token-mix matmuls are unrolled over TB inside the kernel; bound it.
    tb_cap = min(tb_cap, max_unroll)
    cands = [t for t in range(1, min(B, tb_cap) + 1) if B % t == 0]

    def score(t):
        # prefer: TB*L multiple of 128 (full MXU rows, esp. v5e), then an even
        # grid (clean megacore split), then the largest tile.
        return ((t * L) % 128 == 0, (B // t) % 2 == 0, t)

    return max(cands, key=score)


def _build_mixer(B, L, D, TB, x_dtype, vmem_limit, single_buffer_weights):
    grid = (B // TB,)

    def const_spec(shape):
        index_map = lambda b: (0,) * len(shape)
        if single_buffer_weights:
            # constant block index -> the second pipeline buffer is dead VMEM
            return pl.BlockSpec(shape, index_map, pipeline_mode=pl.Buffered(1))
        return pl.BlockSpec(shape, index_map)

    return pl.pallas_call(
        mixer_kernel,
        out_shape=jax.ShapeDtypeStruct((B, L, D), x_dtype),
        grid_spec=pltpu.PrefetchScalarGridSpec(
            num_scalar_prefetch=0,
            grid=grid,
            in_specs=[
                pl.BlockSpec((TB, L, D), lambda b: (b, 0, 0)),   # x (streamed)
                const_spec((4, D)),                              # LN gamma/beta
                const_spec((L, L)),                              # patch W1
                const_spec((L, L)),                              # patch W2
                const_spec((L, 2)),                              # patch biases
                const_spec((D, D)),                              # channel W1 (pre-T)
                const_spec((D, D)),                              # channel W2 (pre-T)
                const_spec((2, D)),                              # channel biases
            ],
            out_specs=pl.BlockSpec((TB, L, D), lambda b: (b, 0, 0)),
            scratch_shapes=[pltpu.VMEM((TB * L, D), jnp.float32)],  # x1 slab
        ),
        compiler_params=pltpu.CompilerParams(
            dimension_semantics=("parallel",),      # batch axis -> megacore
            vmem_limit_bytes=vmem_limit),
    )


_SINGLE_BUFFER_WEIGHTS_OK = None   # probed on first call; falls back if needed


def mixer_layer(x, kparams):
    """x: (B, L, D).  kparams: dict from prepare_params().

    Output dtype mirrors x's dtype: pass bf16 activations to halve HBM traffic
    (v6e is HBM-bound here); element-wise math stays f32 inside the kernel.
    """
    global _SINGLE_BUFFER_WEIGHTS_OK
    B, L, D = x.shape
    weights = (kparams["ln"], kparams["w1p"], kparams["w2p"], kparams["pb"],
               kparams["w1c"], kparams["w2c"], kparams["cb"])
    weight_bytes = sum(int(a.size) * a.dtype.itemsize for a in weights)

    # Per-generation VMEM policy: never request the whole VMEM; ~0.75x capacity
    # leaves headroom (≈48 MiB on v7x, ≈96 MiB on v5e/v6e's 128 MiB parts).
    budget = (3 * _tpu_vmem_capacity_bytes()) // 4
    # weights counted x2 (covers the double-buffered fallback path) + headroom
    act_budget = max(budget - 2 * weight_bytes - (4 << 20), 1)
    TB = _choose_batch_tile(B, L, D, act_budget_bytes=act_budget)

    est = 2 * weight_bytes + TB * _per_batch_vmem_bytes(L, D) + (4 << 20)
    vmem_limit = int(min(budget, max(est, 16 << 20)))

    args = (x,) + weights

    if _SINGLE_BUFFER_WEIGHTS_OK in (None, True):
        try:
            call = _build_mixer(B, L, D, TB, x.dtype, vmem_limit, True)
            out = call(*args)
            if _SINGLE_BUFFER_WEIGHTS_OK is None:
                jax.block_until_ready(out)
                _SINGLE_BUFFER_WEIGHTS_OK = True
            return out
        except Exception:
            _SINGLE_BUFFER_WEIGHTS_OK = False
    call = _build_mixer(B, L, D, TB, x.dtype, vmem_limit, False)
    return call(*args)


# ----------------------------------------------------------------------------
# Parameters (PyTorch layout) + packing + pure-JAX reference
# ----------------------------------------------------------------------------

def init_params(key, patch, dim):
    """Synthetic parameters in PyTorch layout (nn.Linear weight = (out, in))."""
    ks = jax.random.split(key, 8)
    s_p = 1.0 / (patch ** 0.5)
    s_d = 1.0 / (dim ** 0.5)
    u = jax.random.uniform
    return {
        "g1": jnp.ones((dim,), jnp.float32),
        "b1": jnp.zeros((dim,), jnp.float32),
        "g2": jnp.ones((dim,), jnp.float32),
        "b2": jnp.zeros((dim,), jnp.float32),
        "w1p": u(ks[0], (patch, patch), jnp.float32, -s_p, s_p),
        "bp1": u(ks[1], (patch,), jnp.float32, -s_p, s_p),
        "w2p": u(ks[2], (patch, patch), jnp.float32, -s_p, s_p),
        "bp2": u(ks[3], (patch,), jnp.float32, -s_p, s_p),
        "w1c": u(ks[4], (dim, dim), jnp.float32, -s_d, s_d),
        "bc1": u(ks[5], (dim,), jnp.float32, -s_d, s_d),
        "w2c": u(ks[6], (dim, dim), jnp.float32, -s_d, s_d),
        "bc2": u(ks[7], (dim,), jnp.float32, -s_d, s_d),
    }


def prepare_params(p, matmul_dtype=MATMUL_DTYPE):
    """Pack / pre-transpose PyTorch-layout params for the kernel.

    * patch-MLP weights used as-is (left-multiply replaces the transposes);
      channel-MLP weights pre-transposed to (in, out).
    * matmul weights stored in `matmul_dtype` (bf16 by default; pass
      jnp.float32 for bit-closer numerics).
    * small vectors packed so only 7 weight inputs reach the kernel.
    """
    return {
        "ln": jnp.stack([p["g1"], p["b1"], p["g2"], p["b2"]], 0),  # (4, D) f32
        "w1p": p["w1p"].astype(matmul_dtype),                      # (L, L)
        "w2p": p["w2p"].astype(matmul_dtype),                      # (L, L)
        "pb": jnp.stack([p["bp1"], p["bp2"]], 1),                  # (L, 2) f32
        "w1c": p["w1c"].T.astype(matmul_dtype),                    # (D, D)
        "w2c": p["w2c"].T.astype(matmul_dtype),                    # (D, D)
        "cb": jnp.stack([p["bc1"], p["bc2"]], 0),                  # (2, D) f32
    }


def mixer_layer_ref(x, p, approximate_gelu=False):
    """Pure-JAX f32 reference implementing the PyTorch forward (eval mode)."""
    def ln(v, g, b):
        mu = jnp.mean(v, -1, keepdims=True)
        var = jnp.mean((v - mu) ** 2, -1, keepdims=True)
        return (v - mu) * jax.lax.rsqrt(var + _LN_EPS) * g + b

    def gelu(v):
        if approximate_gelu:
            return 0.5 * v * (1.0 + jnp.tanh(_SQRT_2_OVER_PI * (v + 0.044715 * v ** 3)))
        return 0.5 * v * (1.0 + jax.lax.erf(v * _INV_SQRT_2))

    y = ln(x, p["g1"], p["b1"])
    y = jnp.swapaxes(y, -2, -1)                                 # (B, D, L)
    y = gelu(y @ p["w1p"].T + p["bp1"]) @ p["w2p"].T + p["bp2"]
    y = jnp.swapaxes(y, -2, -1)                                 # (B, L, D)
    x1 = y + x
    z = ln(x1, p["g2"], p["b2"])
    z = gelu(z @ p["w1c"].T + p["bc1"]) @ p["w2c"].T + p["bc2"]
    return z + x1


if __name__ == "__main__":
    # batch, max_length (patch), feature_dim — small, but big enough that the
    # batch tiling (TB=2, 4 grid steps) and the wide channel matmul are used.
    B, L, D = 8, 8, 32
    key = jax.random.PRNGKey(0)
    kx, kp = jax.random.split(key)
    x = jax.random.normal(kx, (B, L, D), jnp.float32)
    raw = init_params(kp, patch=L, dim=D)
    kparams = prepare_params(raw)

    out = jax.block_until_ready(mixer_layer(x, kparams))
    assert out.shape == (B, L, D)

    # Matched-GELU f32 reference: isolates bf16-MXU error.
    ref_same = mixer_layer_ref(x, raw, approximate_gelu=GELU_APPROXIMATE)
    assert jnp.allclose(out, ref_same, atol=3e-2, rtol=3e-2), \
        "mismatch vs matched-GELU reference"

    # Exact-erf reference (torch.nn.GELU() default): looser bound that also
    # covers the tanh-GELU approximation gap sanctioned by the perf review.
    ref_exact = mixer_layer_ref(x, raw, approximate_gelu=False)
    assert jnp.allclose(out, ref_exact, atol=1e-1, rtol=1e-1), \
        "mismatch vs exact-GELU reference"

    print("KERNEL_OK")
</pallas_src>

<mosaic_0001>
module attributes {stable_mosaic.version = 11 : i64} {
  func.func @mixer_kernel(%arg0: i32, %arg1: memref<2x8x32xf32, #tpu.memory_space<vmem>>, %arg2: memref<4x32xf32, #tpu.memory_space<vmem>>, %arg3: memref<8x8xbf16, #tpu.memory_space<vmem>>, %arg4: memref<8x8xbf16, #tpu.memory_space<vmem>>, %arg5: memref<8x2xf32, #tpu.memory_space<vmem>>, %arg6: memref<32x32xbf16, #tpu.memory_space<vmem>>, %arg7: memref<32x32xbf16, #tpu.memory_space<vmem>>, %arg8: memref<2x32xf32, #tpu.memory_space<vmem>>, %arg9: memref<2x8x32xf32, #tpu.memory_space<vmem>>, %arg10: memref<16x32xf32, #tpu.memory_space<vmem>>) attributes {dimension_semantics = [#tpu.dimension_semantics<parallel>], iteration_bounds = array<i64: 4>, scalar_prefetch = 0 : i64, scratch_operands = 1 : i64, tpu.core_type = #tpu.core_type<tc>, window_params = [{transform_indices = @transform_0, window_bounds = array<i64: 2, 8, 32>}, {pipeline_mode = #tpu.pipeline_mode<synchronous>, transform_indices = @transform_1, window_bounds = array<i64: 4, 32>}, {pipeline_mode = #tpu.pipeline_mode<synchronous>, transform_indices = @transform_2, window_bounds = array<i64: 8, 8>}, {pipeline_mode = #tpu.pipeline_mode<synchronous>, transform_indices = @transform_3, window_bounds = array<i64: 8, 8>}, {pipeline_mode = #tpu.pipeline_mode<synchronous>, transform_indices = @transform_4, window_bounds = array<i64: 8, 2>}, {pipeline_mode = #tpu.pipeline_mode<synchronous>, transform_indices = @transform_5, window_bounds = array<i64: 32, 32>}, {pipeline_mode = #tpu.pipeline_mode<synchronous>, transform_indices = @transform_6, window_bounds = array<i64: 32, 32>}, {pipeline_mode = #tpu.pipeline_mode<synchronous>, transform_indices = @transform_7, window_bounds = array<i64: 2, 32>}, {transform_indices = @transform_8, window_bounds = array<i64: 2, 8, 32>}]} {
    %c0 = arith.constant 0 : index
    %c0_0 = arith.constant 0 : index
    %c0_1 = arith.constant 0 : index
    %0 = vector.load %arg1[%c0, %c0_0, %c0_1] : memref<2x8x32xf32, #tpu.memory_space<vmem>>, vector<2x8x32xf32>
    %c0_2 = arith.constant 0 : index
    %c0_3 = arith.constant 0 : index
    %1 = vector.load %arg2[%c0_2, %c0_3] : memref<4x32xf32, #tpu.memory_space<vmem>>, vector<4x32xf32>
    %2 = vector.extract_strided_slice %1 {offsets = [0, 0], sizes = [1, 32], strides = [1, 1]} : vector<4x32xf32> to vector<1x32xf32>
    %3 = vector.extract_strided_slice %1 {offsets = [1, 0], sizes = [1, 32], strides = [1, 1]} : vector<4x32xf32> to vector<1x32xf32>
    %4 = vector.extract_strided_slice %1 {offsets = [2, 0], sizes = [1, 32], strides = [1, 1]} : vector<4x32xf32> to vector<1x32xf32>
    %5 = vector.extract_strided_slice %1 {offsets = [3, 0], sizes = [1, 32], strides = [1, 1]} : vector<4x32xf32> to vector<1x32xf32>
    %c0_4 = arith.constant 0 : index
    %c0_5 = arith.constant 0 : index
    %6 = vector.load %arg5[%c0_4, %c0_5] : memref<8x2xf32, #tpu.memory_space<vmem>>, vector<8x2xf32>
    %7 = vector.extract_strided_slice %6 {offsets = [0, 0], sizes = [8, 1], strides = [1, 1]} : vector<8x2xf32> to vector<8x1xf32>
    %8 = vector.extract_strided_slice %6 {offsets = [0, 1], sizes = [8, 1], strides = [1, 1]} : vector<8x2xf32> to vector<8x1xf32>
    %c0_6 = arith.constant 0 : index
    %c0_7 = arith.constant 0 : index
    %9 = vector.load %arg8[%c0_6, %c0_7] : memref<2x32xf32, #tpu.memory_space<vmem>>, vector<2x32xf32>
    %10 = vector.extract_strided_slice %9 {offsets = [0, 0], sizes = [1, 32], strides = [1, 1]} : vector<2x32xf32> to vector<1x32xf32>
    %11 = vector.extract_strided_slice %9 {offsets = [1, 0], sizes = [1, 32], strides = [1, 1]} : vector<2x32xf32> to vector<1x32xf32>
    %c0_8 = arith.constant 0 : index
    %c0_9 = arith.constant 0 : index
    %12 = vector.load %arg3[%c0_8, %c0_9] : memref<8x8xbf16, #tpu.memory_space<vmem>>, vector<8x8xbf16>
    %c0_10 = arith.constant 0 : index
    %c0_11 = arith.constant 0 : index
    %13 = vector.load %arg4[%c0_10, %c0_11] : memref<8x8xbf16, #tpu.memory_space<vmem>>, vector<8x8xbf16>
    %c0_12 = arith.constant 0 : index
    %c0_13 = arith.constant 0 : index
    %14 = vector.load %arg6[%c0_12, %c0_13] : memref<32x32xbf16, #tpu.memory_space<vmem>>, vector<32x32xbf16>
    %c0_14 = arith.constant 0 : index
    %c0_15 = arith.constant 0 : index
    %15 = vector.load %arg7[%c0_14, %c0_15] : memref<32x32xbf16, #tpu.memory_space<vmem>>, vector<32x32xbf16>
    %cst = arith.constant dense<0.000000e+00> : vector<2x8xf32>
    %16 = vector.multi_reduction <add>, %0, %cst [2] : vector<2x8x32xf32> to vector<2x8xf32>
    %17 = vector.shape_cast %16 : vector<2x8xf32> to vector<2x8x1xf32>
    %cst_16 = arith.constant 3.200000e+01 : f32
    %18 = vector.broadcast %cst_16 : f32 to vector<2x8x1xf32>
    %19 = arith.divf %17, %18 : vector<2x8x1xf32>
    %20 = arith.mulf %0, %0 : vector<2x8x32xf32>
    %cst_17 = arith.constant dense<0.000000e+00> : vector<2x8xf32>
    %21 = vector.multi_reduction <add>, %20, %cst_17 [2] : vector<2x8x32xf32> to vector<2x8xf32>
    %22 = vector.shape_cast %21 : vector<2x8xf32> to vector<2x8x1xf32>
    %cst_18 = arith.constant 3.200000e+01 : f32
    %23 = vector.broadcast %cst_18 : f32 to vector<2x8x1xf32>
    %24 = arith.divf %22, %23 : vector<2x8x1xf32>
    %25 = arith.mulf %19, %19 : vector<2x8x1xf32>
    %26 = arith.subf %24, %25 : vector<2x8x1xf32>
    %cst_19 = arith.constant 0.000000e+00 : f32
    %27 = vector.broadcast %cst_19 : f32 to vector<2x8x1xf32>
    %28 = arith.maximumf %26, %27 : vector<2x8x1xf32>
    %29 = vector.broadcast %19 : vector<2x8x1xf32> to vector<2x8x32xf32>
    %30 = arith.subf %0, %29 : vector<2x8x32xf32>
    %cst_20 = arith.constant 9.99999974E-6 : f32
    %31 = vector.broadcast %cst_20 : f32 to vector<2x8x1xf32>
    %32 = arith.addf %28, %31 : vector<2x8x1xf32>
    %33 = math.rsqrt %32 : vector<2x8x1xf32>
    %34 = vector.broadcast %33 : vector<2x8x1xf32> to vector<2x8x32xf32>
    %35 = arith.mulf %30, %34 : vector<2x8x32xf32>
    %36 = vector.shape_cast %2 : vector<1x32xf32> to vector<1x1x32xf32>
    %37 = vector.broadcast %36 : vector<1x1x32xf32> to vector<2x8x32xf32>
    %38 = arith.mulf %35, %37 : vector<2x8x32xf32>
    %39 = vector.shape_cast %3 : vector<1x32xf32> to vector<1x1x32xf32>
    %40 = vector.broadcast %39 : vector<1x1x32xf32> to vector<2x8x32xf32>
    %41 = arith.addf %38, %40 : vector<2x8x32xf32>
    %42 = vector.extract_strided_slice %41 {offsets = [0, 0, 0], sizes = [1, 8, 32], strides = [1, 1, 1]} : vector<2x8x32xf32> to vector<1x8x32xf32>
    %43 = vector.shape_cast %42 : vector<1x8x32xf32> to vector<8x32xf32>
    %44 = arith.truncf %43 : vector<8x32xf32> to vector<8x32xbf16>
    %cst_21 = arith.constant dense<0.000000e+00> : vector<8x32xf32>
    %45 = tpu.matmul %12, %44, %cst_21 {dimension_numbers = #tpu.dot_dimension_numbers<[1], [0], [0], [1], [0, 0, 1, 1], [], []>} : vector<8x8xbf16>, vector<8x32xbf16>, vector<8x32xf32> -> vector<8x32xf32>
    %46 = vector.broadcast %7 : vector<8x1xf32> to vector<8x32xf32>
    %47 = arith.addf %45, %46 : vector<8x32xf32>
    %cst_22 = arith.constant 5.000000e-01 : f32
    %48 = vector.broadcast %cst_22 : f32 to vector<8x32xf32>
    %49 = arith.mulf %48, %47 : vector<8x32xf32>
    %50 = arith.mulf %47, %47 : vector<8x32xf32>
    %51 = arith.mulf %50, %47 : vector<8x32xf32>
    %cst_23 = arith.constant 4.471500e-02 : f32
    %52 = vector.broadcast %cst_23 : f32 to vector<8x32xf32>
    %53 = arith.mulf %52, %51 : vector<8x32xf32>
    %54 = arith.addf %47, %53 : vector<8x32xf32>
    %cst_24 = arith.constant 0.797884583 : f32
    %55 = vector.broadcast %cst_24 : f32 to vector<8x32xf32>
    %56 = arith.mulf %55, %54 : vector<8x32xf32>
    %57 = math.tanh %56 : vector<8x32xf32>
    %cst_25 = arith.constant 1.000000e+00 : f32
    %58 = vector.broadcast %cst_25 : f32 to vector<8x32xf32>
    %59 = arith.addf %58, %57 : vector<8x32xf32>
    %60 = arith.mulf %49, %59 : vector<8x32xf32>
    %61 = arith.truncf %60 : vector<8x32xf32> to vector<8x32xbf16>
    %cst_26 = arith.constant dense<0.000000e+00> : vector<8x32xf32>
    %62 = tpu.matmul %13, %61, %cst_26 {dimension_numbers = #tpu.dot_dimension_numbers<[1], [0], [0], [1], [0, 0, 1, 1], [], []>} : vector<8x8xbf16>, vector<8x32xbf16>, vector<8x32xf32> -> vector<8x32xf32>
    %63 = vector.broadcast %8 : vector<8x1xf32> to vector<8x32xf32>
    %64 = arith.addf %62, %63 : vector<8x32xf32>
    %65 = vector.extract_strided_slice %0 {offsets = [0, 0, 0], sizes = [1, 8, 32], strides = [1, 1, 1]} : vector<2x8x32xf32> to vector<1x8x32xf32>
    %66 = vector.shape_cast %65 : vector<1x8x32xf32> to vector<8x32xf32>
    %67 = arith.addf %64, %66 : vector<8x32xf32>
    %c0_27 = arith.constant 0 : index
    %c0_28 = arith.constant 0 : index
    %68 = vector.load %arg10[%c0_27, %c0_28] : memref<16x32xf32, #tpu.memory_space<vmem>>, vector<8x32xf32>
    tpu.vector_store %arg10[%c0_27, %c0_28], %67 {strides = array<i32>} : memref<16x32xf32, #tpu.memory_space<vmem>>, vector<8x32xf32>,
    %69 = vector.extract_strided_slice %41 {offsets = [1, 0, 0], sizes = [1, 8, 32], strides = [1, 1, 1]} : vector<2x8x32xf32> to vector<1x8x32xf32>
    %70 = vector.shape_cast %69 : vector<1x8x32xf32> to vector<8x32xf32>
    %71 = arith.truncf %70 : vector<8x32xf32> to vector<8x32xbf16>
    %cst_29 = arith.constant dense<0.000000e+00> : vector<8x32xf32>
    %72 = tpu.matmul %12, %71, %cst_29 {dimension_numbers = #tpu.dot_dimension_numbers<[1], [0], [0], [1], [0, 0, 1, 1], [], []>} : vector<8x8xbf16>, vector<8x32xbf16>, vector<8x32xf32> -> vector<8x32xf32>
    %73 = vector.broadcast %7 : vector<8x1xf32> to vector<8x32xf32>
    %74 = arith.addf %72, %73 : vector<8x32xf32>
    %cst_30 = arith.constant 5.000000e-01 : f32
    %75 = vector.broadcast %cst_30 : f32 to vector<8x32xf32>
    %76 = arith.mulf %75, %74 : vector<8x32xf32>
    %77 = arith.mulf %74, %74 : vector<8x32xf32>
    %78 = arith.mulf %77, %74 : vector<8x32xf32>
    %cst_31 = arith.constant 4.471500e-02 : f32
    %79 = vector.broadcast %cst_31 : f32 to vector<8x32xf32>
    %80 = arith.mulf %79, %78 : vector<8x32xf32>
    %81 = arith.addf %74, %80 : vector<8x32xf32>
    %cst_32 = arith.constant 0.797884583 : f32
    %82 = vector.broadcast %cst_32 : f32 to vector<8x32xf32>
    %83 = arith.mulf %82, %81 : vector<8x32xf32>
    %84 = math.tanh %83 : vector<8x32xf32>
    %cst_33 = arith.constant 1.000000e+00 : f32
    %85 = vector.broadcast %cst_33 : f32 to vector<8x32xf32>
    %86 = arith.addf %85, %84 : vector<8x32xf32>
    %87 = arith.mulf %76, %86 : vector<8x32xf32>
    %88 = arith.truncf %87 : vector<8x32xf32> to vector<8x32xbf16>
    %cst_34 = arith.constant dense<0.000000e+00> : vector<8x32xf32>
    %89 = tpu.matmul %13, %88, %cst_34 {dimension_numbers = #tpu.dot_dimension_numbers<[1], [0], [0], [1], [0, 0, 1, 1], [], []>} : vector<8x8xbf16>, vector<8x32xbf16>, vector<8x32xf32> -> vector<8x32xf32>
    %90 = vector.broadcast %8 : vector<8x1xf32> to vector<8x32xf32>
    %91 = arith.addf %89, %90 : vector<8x32xf32>
    %92 = vector.extract_strided_slice %0 {offsets = [1, 0, 0], sizes = [1, 8, 32], strides = [1, 1, 1]} : vector<2x8x32xf32> to vector<1x8x32xf32>
    %93 = vector.shape_cast %92 : vector<1x8x32xf32> to vector<8x32xf32>
    %94 = arith.addf %91, %93 : vector<8x32xf32>
    %c8 = arith.constant 8 : index
    %c0_35 = arith.constant 0 : index
    %95 = vector.load %arg10[%c8, %c0_35] : memref<16x32xf32, #tpu.memory_space<vmem>>, vector<8x32xf32>
    tpu.vector_store %arg10[%c8, %c0_35], %94 {strides = array<i32>} : memref<16x32xf32, #tpu.memory_space<vmem>>, vector<8x32xf32>,
    %c0_36 = arith.constant 0 : index
    %c0_37 = arith.constant 0 : index
    %96 = vector.load %arg10[%c0_36, %c0_37] : memref<16x32xf32, #tpu.memory_space<vmem>>, vector<16x32xf32>
    %cst_38 = arith.constant dense<0.000000e+00> : vector<16xf32>
    %97 = vector.multi_reduction <add>, %96, %cst_38 [1] : vector<16x32xf32> to vector<16xf32>
    %98 = vector.shape_cast %97 : vector<16xf32> to vector<16x1xf32>
    %cst_39 = arith.constant 3.200000e+01 : f32
    %99 = vector.broadcast %cst_39 : f32 to vector<16x1xf32>
    %100 = arith.divf %98, %99 : vector<16x1xf32>
    %101 = arith.mulf %96, %96 : vector<16x32xf32>
    %cst_40 = arith.constant dense<0.000000e+00> : vector<16xf32>
    %102 = vector.multi_reduction <add>, %101, %cst_40 [1] : vector<16x32xf32> to vector<16xf32>
    %103 = vector.shape_cast %102 : vector<16xf32> to vector<16x1xf32>
    %cst_41 = arith.constant 3.200000e+01 : f32
    %104 = vector.broadcast %cst_41 : f32 to vector<16x1xf32>
    %105 = arith.divf %103, %104 : vector<16x1xf32>
    %106 = arith.mulf %100, %100 : vector<16x1xf32>
    %107 = arith.subf %105, %106 : vector<16x1xf32>
    %cst_42 = arith.constant 0.000000e+00 : f32
    %108 = vector.broadcast %cst_42 : f32 to vector<16x1xf32>
    %109 = arith.maximumf %107, %108 : vector<16x1xf32>
    %110 = vector.broadcast %100 : vector<16x1xf32> to vector<16x32xf32>
    %111 = arith.subf %96, %110 : vector<16x32xf32>
    %cst_43 = arith.constant 9.99999974E-6 : f32
    %112 = vector.broadcast %cst_43 : f32 to vector<16x1xf32>
    %113 = arith.addf %109, %112 : vector<16x1xf32>
    %114 = math.rsqrt %113 : vector<16x1xf32>
    %115 = vector.broadcast %114 : vector<16x1xf32> to vector<16x32xf32>
    %116 = arith.mulf %111, %115 : vector<16x32xf32>
    %117 = vector.broadcast %4 : vector<1x32xf32> to vector<16x32xf32>
    %118 = arith.mulf %116, %117 : vector<16x32xf32>
    %119 = vector.broadcast %5 : vector<1x32xf32> to vector<16x32xf32>
    %120 = arith.addf %118, %119 : vector<16x32xf32>
    %121 = arith.truncf %120 : vector<16x32xf32> to vector<16x32xbf16>
    %cst_44 = arith.constant dense<0.000000e+00> : vector<16x32xf32>
    %122 = tpu.matmul %121, %14, %cst_44 {dimension_numbers = #tpu.dot_dimension_numbers<[1], [0], [0], [1], [0, 0, 1, 1], [], []>} : vector<16x32xbf16>, vector<32x32xbf16>, vector<16x32xf32> -> vector<16x32xf32>
    %123 = vector.broadcast %10 : vector<1x32xf32> to vector<16x32xf32>
    %124 = arith.addf %122, %123 : vector<16x32xf32>
    %cst_45 = arith.constant 5.000000e-01 : f32
    %125 = vector.broadcast %cst_45 : f32 to vector<16x32xf32>
    %126 = arith.mulf %125, %124 : vector<16x32xf32>
    %127 = arith.mulf %124, %124 : vector<16x32xf32>
    %128 = arith.mulf %127, %124 : vector<16x32xf32>
    %cst_46 = arith.constant 4.471500e-02 : f32
    %129 = vector.broadcast %cst_46 : f32 to vector<16x32xf32>
    %130 = arith.mulf %129, %128 : vector<16x32xf32>
    %131 = arith.addf %124, %130 : vector<16x32xf32>
    %cst_47 = arith.constant 0.797884583 : f32
    %132 = vector.broadcast %cst_47 : f32 to vector<16x32xf32>
    %133 = arith.mulf %132, %131 : vector<16x32xf32>
    %134 = math.tanh %133 : vector<16x32xf32>
    %cst_48 = arith.constant 1.000000e+00 : f32
    %135 = vector.broadcast %cst_48 : f32 to vector<16x32xf32>
    %136 = arith.addf %135, %134 : vector<16x32xf32>
    %137 = arith.mulf %126, %136 : vector<16x32xf32>
    %138 = arith.truncf %137 : vector<16x32xf32> to vector<16x32xbf16>
    %cst_49 = arith.constant dense<0.000000e+00> : vector<16x32xf32>
    %139 = tpu.matmul %138, %15, %cst_49 {dimension_numbers = #tpu.dot_dimension_numbers<[1], [0], [0], [1], [0, 0, 1, 1], [], []>} : vector<16x32xbf16>, vector<32x32xbf16>, vector<16x32xf32> -> vector<16x32xf32>
    %140 = vector.broadcast %11 : vector<1x32xf32> to vector<16x32xf32>
    %141 = arith.addf %139, %140 : vector<16x32xf32>
    %142 = arith.addf %141, %96 : vector<16x32xf32>
    %143 = vector.shape_cast %142 : vector<16x32xf32> to vector<2x8x32xf32>
    %c0_50 = arith.constant 0 : index
    %c0_51 = arith.constant 0 : index
    %c0_52 = arith.constant 0 : index
    %144 = vector.load %arg9[%c0_50, %c0_51, %c0_52] : memref<2x8x32xf32, #tpu.memory_space<vmem>>, vector<2x8x32xf32>
    tpu.vector_store %arg9[%c0_50, %c0_51, %c0_52], %143 {strides = array<i32>} : memref<2x8x32xf32, #tpu.memory_space<vmem>>, vector<2x8x32xf32>,
    return
  }
  func.func @transform_0(%arg0: i32) -> (i32, i32, i32) {
    %c0_i32 = arith.constant 0 : i32
    %c0_i32_0 = arith.constant 0 : i32
    %c0_i32_1 = arith.constant 0 : i32
    return %arg0, %c0_i32, %c0_i32_0 : i32, i32, i32
  }
  func.func @transform_1(%arg0: i32) -> (i32, i32) {
    %c0_i32 = arith.constant 0 : i32
    %c0_i32_0 = arith.constant 0 : i32
    %c0_i32_1 = arith.constant 0 : i32
    return %c0_i32, %c0_i32_0 : i32, i32
  }
  func.func @transform_2(%arg0: i32) -> (i32, i32) {
    %c0_i32 = arith.constant 0 : i32
    %c0_i32_0 = arith.constant 0 : i32
    %c0_i32_1 = arith.constant 0 : i32
    return %c0_i32, %c0_i32_0 : i32, i32
  }
  func.func @transform_3(%arg0: i32) -> (i32, i32) {
    %c0_i32 = arith.constant 0 : i32
    %c0_i32_0 = arith.constant 0 : i32
    %c0_i32_1 = arith.constant 0 : i32
    return %c0_i32, %c0_i32_0 : i32, i32
  }
  func.func @transform_4(%arg0: i32) -> (i32, i32) {
    %c0_i32 = arith.constant 0 : i32
    %c0_i32_0 = arith.constant 0 : i32
    %c0_i32_1 = arith.constant 0 : i32
    return %c0_i32, %c0_i32_0 : i32, i32
  }
  func.func @transform_5(%arg0: i32) -> (i32, i32) {
    %c0_i32 = arith.constant 0 : i32
    %c0_i32_0 = arith.constant 0 : i32
    %c0_i32_1 = arith.constant 0 : i32
    return %c0_i32, %c0_i32_0 : i32, i32
  }
  func.func @transform_6(%arg0: i32) -> (i32, i32) {
    %c0_i32 = arith.constant 0 : i32
    %c0_i32_0 = arith.constant 0 : i32
    %c0_i32_1 = arith.constant 0 : i32
    return %c0_i32, %c0_i32_0 : i32, i32
  }
  func.func @transform_7(%arg0: i32) -> (i32, i32) {
    %c0_i32 = arith.constant 0 : i32
    %c0_i32_0 = arith.constant 0 : i32
    %c0_i32_1 = arith.constant 0 : i32
    return %c0_i32, %c0_i32_0 : i32, i32
  }
  func.func @transform_8(%arg0: i32) -> (i32, i32, i32) {
    %c0_i32 = arith.constant 0 : i32
    %c0_i32_0 = arith.constant 0 : i32
    %c0_i32_1 = arith.constant 0 : i32
    return %arg0, %c0_i32, %c0_i32_0 : i32, i32, i32
  }
}

module attributes {stable_mosaic.version = 11 : i64} {
  func.func @mixer_kernel(%arg0: i32, %arg1: memref<2x8x32xf32, #tpu.memory_space<vmem>>, %arg2: memref<4x32xf32, #tpu.memory_space<vmem>>, %arg3: memref<8x8xbf16, #tpu.memory_space<vmem>>, %arg4: memref<8x8xbf16, #tpu.memory_space<vmem>>, %arg5: memref<8x2xf32, #tpu.memory_space<vmem>>, %arg6: memref<32x32xbf16, #tpu.memory_space<vmem>>, %arg7: memref<32x32xbf16, #tpu.memory_space<vmem>>, %arg8: memref<2x32xf32, #tpu.memory_space<vmem>>, %arg9: memref<2x8x32xf32, #tpu.memory_space<vmem>>, %arg10: memref<16x32xf32, #tpu.memory_space<vmem>>) attributes {dimension_semantics = [#tpu.dimension_semantics<parallel>], iteration_bounds = array<i64: 4>, scalar_prefetch = 0 : i64, scratch_operands = 1 : i64, tpu.core_type = #tpu.core_type<tc>, window_params = [{transform_indices = @transform_0, window_bounds = array<i64: 2, 8, 32>}, {pipeline_mode = #tpu.pipeline_mode<synchronous>, transform_indices = @transform_1, window_bounds = array<i64: 4, 32>}, {pipeline_mode = #tpu.pipeline_mode<synchronous>, transform_indices = @transform_2, window_bounds = array<i64: 8, 8>}, {pipeline_mode = #tpu.pipeline_mode<synchronous>, transform_indices = @transform_3, window_bounds = array<i64: 8, 8>}, {pipeline_mode = #tpu.pipeline_mode<synchronous>, transform_indices = @transform_4, window_bounds = array<i64: 8, 2>}, {pipeline_mode = #tpu.pipeline_mode<synchronous>, transform_indices = @transform_5, window_bounds = array<i64: 32, 32>}, {pipeline_mode = #tpu.pipeline_mode<synchronous>, transform_indices = @transform_6, window_bounds = array<i64: 32, 32>}, {pipeline_mode = #tpu.pipeline_mode<synchronous>, transform_indices = @transform_7, window_bounds = array<i64: 2, 32>}, {transform_indices = @transform_8, window_bounds = array<i64: 2, 8, 32>}]} {
    %c0 = arith.constant 0 : index
    %c0_0 = arith.constant 0 : index
    %c0_1 = arith.constant 0 : index
    %0 = vector.load %arg1[%c0, %c0_0, %c0_1] : memref<2x8x32xf32, #tpu.memory_space<vmem>>, vector<2x8x32xf32>
    %c0_2 = arith.constant 0 : index
    %c0_3 = arith.constant 0 : index
    %1 = vector.load %arg2[%c0_2, %c0_3] : memref<4x32xf32, #tpu.memory_space<vmem>>, vector<4x32xf32>
    %2 = vector.extract_strided_slice %1 {offsets = [0, 0], sizes = [1, 32], strides = [1, 1]} : vector<4x32xf32> to vector<1x32xf32>
    %3 = vector.extract_strided_slice %1 {offsets = [1, 0], sizes = [1, 32], strides = [1, 1]} : vector<4x32xf32> to vector<1x32xf32>
    %4 = vector.extract_strided_slice %1 {offsets = [2, 0], sizes = [1, 32], strides = [1, 1]} : vector<4x32xf32> to vector<1x32xf32>
    %5 = vector.extract_strided_slice %1 {offsets = [3, 0], sizes = [1, 32], strides = [1, 1]} : vector<4x32xf32> to vector<1x32xf32>
    %c0_4 = arith.constant 0 : index
    %c0_5 = arith.constant 0 : index
    %6 = vector.load %arg5[%c0_4, %c0_5] : memref<8x2xf32, #tpu.memory_space<vmem>>, vector<8x2xf32>
    %7 = vector.extract_strided_slice %6 {offsets = [0, 0], sizes = [8, 1], strides = [1, 1]} : vector<8x2xf32> to vector<8x1xf32>
    %8 = vector.extract_strided_slice %6 {offsets = [0, 1], sizes = [8, 1], strides = [1, 1]} : vector<8x2xf32> to vector<8x1xf32>
    %c0_6 = arith.constant 0 : index
    %c0_7 = arith.constant 0 : index
    %9 = vector.load %arg8[%c0_6, %c0_7] : memref<2x32xf32, #tpu.memory_space<vmem>>, vector<2x32xf32>
    %10 = vector.extract_strided_slice %9 {offsets = [0, 0], sizes = [1, 32], strides = [1, 1]} : vector<2x32xf32> to vector<1x32xf32>
    %11 = vector.extract_strided_slice %9 {offsets = [1, 0], sizes = [1, 32], strides = [1, 1]} : vector<2x32xf32> to vector<1x32xf32>
    %c0_8 = arith.constant 0 : index
    %c0_9 = arith.constant 0 : index
    %12 = vector.load %arg3[%c0_8, %c0_9] : memref<8x8xbf16, #tpu.memory_space<vmem>>, vector<8x8xbf16>
    %c0_10 = arith.constant 0 : index
    %c0_11 = arith.constant 0 : index
    %13 = vector.load %arg4[%c0_10, %c0_11] : memref<8x8xbf16, #tpu.memory_space<vmem>>, vector<8x8xbf16>
    %c0_12 = arith.constant 0 : index
    %c0_13 = arith.constant 0 : index
    %14 = vector.load %arg6[%c0_12, %c0_13] : memref<32x32xbf16, #tpu.memory_space<vmem>>, vector<32x32xbf16>
    %c0_14 = arith.constant 0 : index
    %c0_15 = arith.constant 0 : index
    %15 = vector.load %arg7[%c0_14, %c0_15] : memref<32x32xbf16, #tpu.memory_space<vmem>>, vector<32x32xbf16>
    %cst = arith.constant dense<0.000000e+00> : vector<2x8xf32>
    %16 = vector.multi_reduction <add>, %0, %cst [2] : vector<2x8x32xf32> to vector<2x8xf32>
    %17 = vector.shape_cast %16 : vector<2x8xf32> to vector<2x8x1xf32>
    %cst_16 = arith.constant 3.200000e+01 : f32
    %18 = vector.broadcast %cst_16 : f32 to vector<2x8x1xf32>
    %19 = arith.divf %17, %18 : vector<2x8x1xf32>
    %20 = arith.mulf %0, %0 : vector<2x8x32xf32>
    %cst_17 = arith.constant dense<0.000000e+00> : vector<2x8xf32>
    %21 = vector.multi_reduction <add>, %20, %cst_17 [2] : vector<2x8x32xf32> to vector<2x8xf32>
    %22 = vector.shape_cast %21 : vector<2x8xf32> to vector<2x8x1xf32>
    %cst_18 = arith.constant 3.200000e+01 : f32
    %23 = vector.broadcast %cst_18 : f32 to vector<2x8x1xf32>
    %24 = arith.divf %22, %23 : vector<2x8x1xf32>
    %25 = arith.mulf %19, %19 : vector<2x8x1xf32>
    %26 = arith.subf %24, %25 : vector<2x8x1xf32>
    %cst_19 = arith.constant 0.000000e+00 : f32
    %27 = vector.broadcast %cst_19 : f32 to vector<2x8x1xf32>
    %28 = arith.maximumf %26, %27 : vector<2x8x1xf32>
    %29 = vector.broadcast %19 : vector<2x8x1xf32> to vector<2x8x32xf32>
    %30 = arith.subf %0, %29 : vector<2x8x32xf32>
    %cst_20 = arith.constant 9.99999974E-6 : f32
    %31 = vector.broadcast %cst_20 : f32 to vector<2x8x1xf32>
    %32 = arith.addf %28, %31 : vector<2x8x1xf32>
    %33 = math.rsqrt %32 : vector<2x8x1xf32>
    %34 = vector.broadcast %33 : vector<2x8x1xf32> to vector<2x8x32xf32>
    %35 = arith.mulf %30, %34 : vector<2x8x32xf32>
    %36 = vector.shape_cast %2 : vector<1x32xf32> to vector<1x1x32xf32>
    %37 = vector.broadcast %36 : vector<1x1x32xf32> to vector<2x8x32xf32>
    %38 = arith.mulf %35, %37 : vector<2x8x32xf32>
    %39 = vector.shape_cast %3 : vector<1x32xf32> to vector<1x1x32xf32>
    %40 = vector.broadcast %39 : vector<1x1x32xf32> to vector<2x8x32xf32>
    %41 = arith.addf %38, %40 : vector<2x8x32xf32>
    %42 = vector.extract_strided_slice %41 {offsets = [0, 0, 0], sizes = [1, 8, 32], strides = [1, 1, 1]} : vector<2x8x32xf32> to vector<1x8x32xf32>
    %43 = vector.shape_cast %42 : vector<1x8x32xf32> to vector<8x32xf32>
    %44 = arith.truncf %43 : vector<8x32xf32> to vector<8x32xbf16>
    %cst_21 = arith.constant dense<0.000000e+00> : vector<8x32xf32>
    %45 = tpu.matmul %12, %44, %cst_21 {dimension_numbers = #tpu.dot_dimension_numbers<[1], [0], [0], [1], [0, 0, 1, 1], [], []>} : vector<8x8xbf16>, vector<8x32xbf16>, vector<8x32xf32> -> vector<8x32xf32>
    %46 = vector.broadcast %7 : vector<8x1xf32> to vector<8x32xf32>
    %47 = arith.addf %45, %46 : vector<8x32xf32>
    %cst_22 = arith.constant 5.000000e-01 : f32
    %48 = vector.broadcast %cst_22 : f32 to vector<8x32xf32>
    %49 = arith.mulf %48, %47 : vector<8x32xf32>
    %50 = arith.mulf %47, %47 : vector<8x32xf32>
    %51 = arith.mulf %50, %47 : vector<8x32xf32>
    %cst_23 = arith.constant 4.471500e-02 : f32
    %52 = vector.broadcast %cst_23 : f32 to vector<8x32xf32>
    %53 = arith.mulf %52, %51 : vector<8x32xf32>
    %54 = arith.addf %47, %53 : vector<8x32xf32>
    %cst_24 = arith.constant 0.797884583 : f32
    %55 = vector.broadcast %cst_24 : f32 to vector<8x32xf32>
    %56 = arith.mulf %55, %54 : vector<8x32xf32>
    %57 = math.tanh %56 : vector<8x32xf32>
    %cst_25 = arith.constant 1.000000e+00 : f32
    %58 = vector.broadcast %cst_25 : f32 to vector<8x32xf32>
    %59 = arith.addf %58, %57 : vector<8x32xf32>
    %60 = arith.mulf %49, %59 : vector<8x32xf32>
    %61 = arith.truncf %60 : vector<8x32xf32> to vector<8x32xbf16>
    %cst_26 = arith.constant dense<0.000000e+00> : vector<8x32xf32>
    %62 = tpu.matmul %13, %61, %cst_26 {dimension_numbers = #tpu.dot_dimension_numbers<[1], [0], [0], [1], [0, 0, 1, 1], [], []>} : vector<8x8xbf16>, vector<8x32xbf16>, vector<8x32xf32> -> vector<8x32xf32>
    %63 = vector.broadcast %8 : vector<8x1xf32> to vector<8x32xf32>
    %64 = arith.addf %62, %63 : vector<8x32xf32>
    %65 = vector.extract_strided_slice %0 {offsets = [0, 0, 0], sizes = [1, 8, 32], strides = [1, 1, 1]} : vector<2x8x32xf32> to vector<1x8x32xf32>
    %66 = vector.shape_cast %65 : vector<1x8x32xf32> to vector<8x32xf32>
    %67 = arith.addf %64, %66 : vector<8x32xf32>
    %c0_27 = arith.constant 0 : index
    %c0_28 = arith.constant 0 : index
    %68 = vector.load %arg10[%c0_27, %c0_28] : memref<16x32xf32, #tpu.memory_space<vmem>>, vector<8x32xf32>
    tpu.vector_store %arg10[%c0_27, %c0_28], %67 {strides = array<i32>} : memref<16x32xf32, #tpu.memory_space<vmem>>, vector<8x32xf32>,
    %69 = vector.extract_strided_slice %41 {offsets = [1, 0, 0], sizes = [1, 8, 32], strides = [1, 1, 1]} : vector<2x8x32xf32> to vector<1x8x32xf32>
    %70 = vector.shape_cast %69 : vector<1x8x32xf32> to vector<8x32xf32>
    %71 = arith.truncf %70 : vector<8x32xf32> to vector<8x32xbf16>
    %cst_29 = arith.constant dense<0.000000e+00> : vector<8x32xf32>
    %72 = tpu.matmul %12, %71, %cst_29 {dimension_numbers = #tpu.dot_dimension_numbers<[1], [0], [0], [1], [0, 0, 1, 1], [], []>} : vector<8x8xbf16>, vector<8x32xbf16>, vector<8x32xf32> -> vector<8x32xf32>
    %73 = vector.broadcast %7 : vector<8x1xf32> to vector<8x32xf32>
    %74 = arith.addf %72, %73 : vector<8x32xf32>
    %cst_30 = arith.constant 5.000000e-01 : f32
    %75 = vector.broadcast %cst_30 : f32 to vector<8x32xf32>
    %76 = arith.mulf %75, %74 : vector<8x32xf32>
    %77 = arith.mulf %74, %74 : vector<8x32xf32>
    %78 = arith.mulf %77, %74 : vector<8x32xf32>
    %cst_31 = arith.constant 4.471500e-02 : f32
    %79 = vector.broadcast %cst_31 : f32 to vector<8x32xf32>
    %80 = arith.mulf %79, %78 : vector<8x32xf32>
    %81 = arith.addf %74, %80 : vector<8x32xf32>
    %cst_32 = arith.constant 0.797884583 : f32
    %82 = vector.broadcast %cst_32 : f32 to vector<8x32xf32>
    %83 = arith.mulf %82, %81 : vector<8x32xf32>
    %84 = math.tanh %83 : vector<8x32xf32>
    %cst_33 = arith.constant 1.000000e+00 : f32
    %85 = vector.broadcast %cst_33 : f32 to vector<8x32xf32>
    %86 = arith.addf %85, %84 : vector<8x32xf32>
    %87 = arith.mulf %76, %86 : vector<8x32xf32>
    %88 = arith.truncf %87 : vector<8x32xf32> to vector<8x32xbf16>
    %cst_34 = arith.constant dense<0.000000e+00> : vector<8x32xf32>
    %89 = tpu.matmul %13, %88, %cst_34 {dimension_numbers = #tpu.dot_dimension_numbers<[1], [0], [0], [1], [0, 0, 1, 1], [], []>} : vector<8x8xbf16>, vector<8x32xbf16>, vector<8x32xf32> -> vector<8x32xf32>
    %90 = vector.broadcast %8 : vector<8x1xf32> to vector<8x32xf32>
    %91 = arith.addf %89, %90 : vector<8x32xf32>
    %92 = vector.extract_strided_slice %0 {offsets = [1, 0, 0], sizes = [1, 8, 32], strides = [1, 1, 1]} : vector<2x8x32xf32> to vector<1x8x32xf32>
    %93 = vector.shape_cast %92 : vector<1x8x32xf32> to vector<8x32xf32>
    %94 = arith.addf %91, %93 : vector<8x32xf32>
    %c8 = arith.constant 8 : index
    %c0_35 = arith.constant 0 : index
    %95 = vector.load %arg10[%c8, %c0_35] : memref<16x32xf32, #tpu.memory_space<vmem>>, vector<8x32xf32>
    tpu.vector_store %arg10[%c8, %c0_35], %94 {strides = array<i32>} : memref<16x32xf32, #tpu.memory_space<vmem>>, vector<8x32xf32>,
    %c0_36 = arith.constant 0 : index
    %c0_37 = arith.constant 0 : index
    %96 = vector.load %arg10[%c0_36, %c0_37] : memref<16x32xf32, #tpu.memory_space<vmem>>, vector<16x32xf32>
    %cst_38 = arith.constant dense<0.000000e+00> : vector<16xf32>
    %97 = vector.multi_reduction <add>, %96, %cst_38 [1] : vector<16x32xf32> to vector<16xf32>
    %98 = vector.shape_cast %97 : vector<16xf32> to vector<16x1xf32>
    %cst_39 = arith.constant 3.200000e+01 : f32
    %99 = vector.broadcast %cst_39 : f32 to vector<16x1xf32>
    %100 = arith.divf %98, %99 : vector<16x1xf32>
    %101 = arith.mulf %96, %96 : vector<16x32xf32>
    %cst_40 = arith.constant dense<0.000000e+00> : vector<16xf32>
    %102 = vector.multi_reduction <add>, %101, %cst_40 [1] : vector<16x32xf32> to vector<16xf32>
    %103 = vector.shape_cast %102 : vector<16xf32> to vector<16x1xf32>
    %cst_41 = arith.constant 3.200000e+01 : f32
    %104 = vector.broadcast %cst_41 : f32 to vector<16x1xf32>
    %105 = arith.divf %103, %104 : vector<16x1xf32>
    %106 = arith.mulf %100, %100 : vector<16x1xf32>
    %107 = arith.subf %105, %106 : vector<16x1xf32>
    %cst_42 = arith.constant 0.000000e+00 : f32
    %108 = vector.broadcast %cst_42 : f32 to vector<16x1xf32>
    %109 = arith.maximumf %107, %108 : vector<16x1xf32>
    %110 = vector.broadcast %100 : vector<16x1xf32> to vector<16x32xf32>
    %111 = arith.subf %96, %110 : vector<16x32xf32>
    %cst_43 = arith.constant 9.99999974E-6 : f32
    %112 = vector.broadcast %cst_43 : f32 to vector<16x1xf32>
    %113 = arith.addf %109, %112 : vector<16x1xf32>
    %114 = math.rsqrt %113 : vector<16x1xf32>
    %115 = vector.broadcast %114 : vector<16x1xf32> to vector<16x32xf32>
    %116 = arith.mulf %111, %115 : vector<16x32xf32>
    %117 = vector.broadcast %4 : vector<1x32xf32> to vector<16x32xf32>
    %118 = arith.mulf %116, %117 : vector<16x32xf32>
    %119 = vector.broadcast %5 : vector<1x32xf32> to vector<16x32xf32>
    %120 = arith.addf %118, %119 : vector<16x32xf32>
    %121 = arith.truncf %120 : vector<16x32xf32> to vector<16x32xbf16>
    %cst_44 = arith.constant dense<0.000000e+00> : vector<16x32xf32>
    %122 = tpu.matmul %121, %14, %cst_44 {dimension_numbers = #tpu.dot_dimension_numbers<[1], [0], [0], [1], [0, 0, 1, 1], [], []>} : vector<16x32xbf16>, vector<32x32xbf16>, vector<16x32xf32> -> vector<16x32xf32>
    %123 = vector.broadcast %10 : vector<1x32xf32> to vector<16x32xf32>
    %124 = arith.addf %122, %123 : vector<16x32xf32>
    %cst_45 = arith.constant 5.000000e-01 : f32
    %125 = vector.broadcast %cst_45 : f32 to vector<16x32xf32>
    %126 = arith.mulf %125, %124 : vector<16x32xf32>
    %127 = arith.mulf %124, %124 : vector<16x32xf32>
    %128 = arith.mulf %127, %124 : vector<16x32xf32>
    %cst_46 = arith.constant 4.471500e-02 : f32
    %129 = vector.broadcast %cst_46 : f32 to vector<16x32xf32>
    %130 = arith.mulf %129, %128 : vector<16x32xf32>
    %131 = arith.addf %124, %130 : vector<16x32xf32>
    %cst_47 = arith.constant 0.797884583 : f32
    %132 = vector.broadcast %cst_47 : f32 to vector<16x32xf32>
    %133 = arith.mulf %132, %131 : vector<16x32xf32>
    %134 = math.tanh %133 : vector<16x32xf32>
    %cst_48 = arith.constant 1.000000e+00 : f32
    %135 = vector.broadcast %cst_48 : f32 to vector<16x32xf32>
    %136 = arith.addf %135, %134 : vector<16x32xf32>
    %137 = arith.mulf %126, %136 : vector<16x32xf32>
    %138 = arith.truncf %137 : vector<16x32xf32> to vector<16x32xbf16>
    %cst_49 = arith.constant dense<0.000000e+00> : vector<16x32xf32>
    %139 = tpu.matmul %138, %15, %cst_49 {dimension_numbers = #tpu.dot_dimension_numbers<[1], [0], [0], [1], [0, 0, 1, 1], [], []>} : vector<16x32xbf16>, vector<32x32xbf16>, vector<16x32xf32> -> vector<16x32xf32>
    %140 = vector.broadcast %11 : vector<1x32xf32> to vector<16x32xf32>
    %141 = arith.addf %139, %140 : vector<16x32xf32>
    %142 = arith.addf %141, %96 : vector<16x32xf32>
    %143 = vector.shape_cast %142 : vector<16x32xf32> to vector<2x8x32xf32>
    %c0_50 = arith.constant 0 : index
    %c0_51 = arith.constant 0 : index
    %c0_52 = arith.constant 0 : index
    %144 = vector.load %arg9[%c0_50, %c0_51, %c0_52] : memref<2x8x32xf32, #tpu.memory_space<vmem>>, vector<2x8x32xf32>
    tpu.vector_store %arg9[%c0_50, %c0_51, %c0_52], %143 {strides = array<i32>} : memref<2x8x32xf32, #tpu.memory_space<vmem>>, vector<2x8x32xf32>,
    return
  }
  func.func @transform_0(%arg0: i32) -> (i32, i32, i32) {
    %c0_i32 = arith.constant 0 : i32
    %c0_i32_0 = arith.constant 0 : i32
    %c0_i32_1 = arith.constant 0 : i32
    return %arg0, %c0_i32, %c0_i32_0 : i32, i32, i32
  }
  func.func @transform_1(%arg0: i32) -> (i32, i32) {
    %c0_i32 = arith.constant 0 : i32
    %c0_i32_0 = arith.constant 0 : i32
    %c0_i32_1 = arith.constant 0 : i32
    return %c0_i32, %c0_i32_0 : i32, i32
  }
  func.func @transform_2(%arg0: i32) -> (i32, i32) {
    %c0_i32 = arith.constant 0 : i32
    %c0_i32_0 = arith.constant 0 : i32
    %c0_i32_1 = arith.constant 0 : i32
    return %c0_i32, %c0_i32_0 : i32, i32
  }
  func.func @transform_3(%arg0: i32) -> (i32, i32) {
    %c0_i32 = arith.constant 0 : i32
    %c0_i32_0 = arith.constant 0 : i32
    %c0_i32_1 = arith.constant 0 : i32
    return %c0_i32, %c0_i32_0 : i32, i32
  }
  func.func @transform_4(%arg0: i32) -> (i32, i32) {
    %c0_i32 = arith.constant 0 : i32
    %c0_i32_0 = arith.constant 0 : i32
    %c0_i32_1 = arith.constant 0 : i32
    return %c0_i32, %c0_i32_0 : i32, i32
  }
  func.func @transform_5(%arg0: i32) -> (i32, i32) {
    %c0_i32 = arith.constant 0 : i32
    %c0_i32_0 = arith.constant 0 : i32
    %c0_i32_1 = arith.constant 0 : i32
    return %c0_i32, %c0_i32_0 : i32, i32
  }
  func.func @transform_6(%arg0: i32) -> (i32, i32) {
    %c0_i32 = arith.constant 0 : i32
    %c0_i32_0 = arith.constant 0 : i32
    %c0_i32_1 = arith.constant 0 : i32
    return %c0_i32, %c0_i32_0 : i32, i32
  }
  func.func @transform_7(%arg0: i32) -> (i32, i32) {
    %c0_i32 = arith.constant 0 : i32
    %c0_i32_0 = arith.constant 0 : i32
    %c0_i32_1 = arith.constant 0 : i32
    return %c0_i32, %c0_i32_0 : i32, i32
  }
  func.func @transform_8(%arg0: i32) -> (i32, i32, i32) {
    %c0_i32 = arith.constant 0 : i32
    %c0_i32_0 = arith.constant 0 : i32
    %c0_i32_1 = arith.constant 0 : i32
    return %arg0, %c0_i32, %c0_i32_0 : i32, i32, i32
  }
}

</mosaic_0001>

<bundles_post_ra>
// kernel: tpu_custom_call.1
= control target key start
LH: loop header
LB: loop body
LE: loop exit
PB: predicated region body
PF: predicated region fallthrough
CT: control target
= control target key end

     0   :  { %s1471_s0 = inlined_call_operand.hbm [shape: f32[8,8,32], index: 0, kind: input, shape index: {}]   ;;  %s1472_s1 = inlined_call_operand.vmem [shape: f32[4,32], index: 1, kind: input, shape index: {}]   ;;  %s1473_s2 = inlined_call_operand.vmem [shape: bf16[8,8], index: 2, kind: input, shape index: {}]   ;;  %s1474_s3 = inlined_call_operand.hbm [shape: bf16[8,8], index: 3, kind: input, shape index: {}]   ;;  %s1475_s4 = inlined_call_operand.vmem [shape: f32[8,2], index: 4, kind: input, shape index: {}]   ;;  %s1476_s5 = inlined_call_operand.hbm [shape: bf16[32,32], index: 5, kind: input, shape index: {}]   ;;  %s1477_s6 = inlined_call_operand.hbm [shape: bf16[32,32], index: 6, kind: input, shape index: {}]   ;;  %s1478_s7 = inlined_call_operand.vmem [shape: f32[2,32], index: 7, kind: input, shape index: {}]   ;;  %s1479_s8 = inlined_call_operand.hbm [shape: f32[8,8,32], index: 8, kind: output, shape index: {}]  }
   0x1   :  { %1480 = sst [smem:[#allocation16_spill]] %s1474_s3 }
   0x2   :  { %1481 = sst [smem:[#allocation17_spill]] %s1476_s5 }
   0x3   :  { %13 = vsyncpa [#allocation4], 0 }
   0x4   :  { %15 = vsyncpa [#allocation4 + $0x1], 0 }
   0x5   :  { %16 = vsyncpa [#allocation7], 0 }
   0x6   :  { %17 = vsyncpa [#allocation10], 0 }
   0x7   :  { %18 = vsyncpa [#allocation5], 0 }
   0x8   :  { %20 = vsyncpa [#allocation5 + $0x1], 0  ;;  %s1231_s27 = smov 0   ;;  %s1233_s28 = smov 0  }
   0x9   :  { %s1235_s29 = smov 0   ;;  %s1237_s30 = smov 0  }
   0xa LB: > { %s1252_s9 = sadd.s32 4294967295, %s1172_s30   ;;  %s823_s10 = sadd.s32 4294967294, %s1172_s30   ;;  %s1172_s30 = sphi %s1237_s30, %s1493_s30   ;;  %s1168_s29 = sphi %s1235_s29, %s1492_s29   ;;  %s1164_s28 = sphi %s1233_s28, %s1491_s28   ;;  %s1160_s27 = sphi %s1231_s27, %s1490_s27  }
   0xb   : > { %p46_p0 = scmp.ne.s32.totalorder %s1164_s28, %s1160_s27  ;;  %p47_p1 = scmp.eq.s32.totalorder %s1252_s9, 0 }
   0xc   : > { %p217_p2 = scmp.eq.s32.totalorder %s1252_s9, 3  ;;  %p223_p3 = scmp.eq.s32.totalorder %s823_s10, 3 }
   0xd   : > { %p1261_p4 = por %p47_p1, %p46_p0  ;;  %p824_p5 = scmp.ge.s32.totalorder %s1172_s30, 1 }
   0xe   : > { %p1266_p6 = por %p223_p3, %p46_p0  ;;  %p230_p7 = scmp.lt.s32.totalorder %s1172_s30, 5 }
   0xf   : > { %s1484_s3 = sld [smem:[#allocation16_spill]]  ;;  %s1174_s17 = smov [#allocation6]  }
  0x10   : > { %p1274_p8 = pnand %p824_p5, %p230_p7  ;;  %s250_s18 = sshll.u32 %s1174_s17, 4  ;;  %s251_s18 = int_to_ptr.vmem [resolvable:$true] %s250_s18 }
  0x11   : > { %s1486_s5 = sld [smem:[#allocation17_spill]]  ;;  %s1175_s23 = smov [#allocation8]  }
  0x12   : > { %p887_p9 = pneg %p1274_p8  ;;  %s264_s24 = sshll.u32 %s1175_s23, 4  ;;  %s265_s24 = int_to_ptr.vmem [resolvable:$true] %s264_s24 }
  0x13   : > { %s1176_s25 = smov 64   ;;  %s1177_s26 = smov 4  }
  0x14   : > { %p1285_p10 = pnand %p887_p9, %p47_p1  ;;  %s276_s14 = sshll.u32 %s1477_s6, 4  ;;  %s277_s14 = int_to_ptr.hbm [resolvable:$true] %s276_s14 }
  0x15   : > { %s248_s15 = sshll.u32 %s1484_s3, 4  ;;  %s1178_s17 = smov [#allocation9]   ;;  %s249_s15 = int_to_ptr.hbm [resolvable:$true] %s248_s15 }
  0x16   : > { %890 = dma.hbm_to_vmem [thread:$0]  (!%p1285_p10), %s249_s15, 64, %s251_s18, [#allocation7]  }
  0x17   : > { %s262_s21 = sshll.u32 %s1486_s5, 4  ;;  %s278_s19 = sshll.u32 %s1178_s17, 4  ;;  %s263_s21 = int_to_ptr.hbm [resolvable:$true] %s262_s21  ;;  %s279_s19 = int_to_ptr.vmem [resolvable:$true] %s278_s19 }
  0x18   : > { %893 = dma.hbm_to_vmem [thread:$0]  (!%p1285_p10), %s263_s21, 256, %s265_s24, [#allocation7], %s1176_s25, %s1176_s25, %s1177_s26  }
  0x19   : > { %896 = dma.hbm_to_vmem [thread:$0]  (!%p1285_p10), %s277_s14, 256, %s279_s19, [#allocation10], %s1176_s25, %s1176_s25, %s1177_s26  }
  0x1a   : > { %s1299_s15 = sadd.s32 1, %s1172_s30   ;;  %s33_s20 = sadd.s32 1, %s1168_s29 }
  0x1b   : > { %s30_s18 = ssub.s32 %s1172_s30, %s1299_s15  ;;  %p40_p12 = scmp.ne.s32.totalorder %s1168_s29, %s1164_s28 }
  0x1c   : > { %p31_p11 = scmp.eq.s32.totalorder %s30_s18, 0  ;;  %p41_p13 = scmp.eq.s32.totalorder %s1172_s30, 0 }
  0x1d   : > { %p908_p0 = scmp.lt.s32.totalorder %s1172_s30, 4  ;;  %p1313_p5 = por %p217_p2, %p40_p12 }
  0x1e   : > { %s1309_s21 = scalar_select %p31_p11, %s1168_s29, %s33_s20  }
  0x1f   : > { %p42_p3 = por %p41_p13, %p40_p12  ;;  %s295_s22 = sand.u32 1, %s1168_s29  }
  0x20   : > { %s865_s24 = sshll.u32 %s1172_s30, 4  ;;  %s829_s25 = sshll.u32 %s295_s22, 4 }
  0x21   : > { %s304_s13 = scalar_lea.hbm %s1471_s0, %s865_s24  ;;  %s299_s17 = scalar_lea.vmem [#allocation3], %s829_s25 }
  0x22   : > { %s305_s14 = sshll.u32 %s304_s13, 4  ;;  %s307_s19 = sshll.u32 %s299_s17, 4  ;;  %s306_s14 = int_to_ptr.hbm [resolvable:$true] %s305_s14  ;;  %s308_s19 = int_to_ptr.vmem [resolvable:$true] %s307_s19 }
  0x23   : > { %p1324_p7 = pnand %p908_p0, %p42_p3  ;;  %s296_s20 = scalar_lea.sflag [#allocation4], %s295_s22 }
  0x24   : > { %s1068_s3 = sshra.s32 %s306_s14, 4  ;;  %s1075_s26 = scalar_lea.hbm %s1471_s0, 64  ;;  %s1069_s3 = int_to_ptr.hbm [resolvable:$true] %s1068_s3 }
  0x25   : > { %s1070_s5 = scalar_lea.hbm %s1069_s3, 16  ;;  %p1072_p9 = pneg %p1324_p7 }
  0x26   : > { %p1071_p2 = scmp.ne.s32.totalorder %s1069_s3, %s1070_s5  ;;  %p1076_p12 = scmp.lt.s32.totalorder %s1069_s3, %s1471_s0 }
  0x27   : > { %p1077_p13 = scmp.lt.s32.totalorder %s1075_s26, %s1070_s5 }
  0x28   : > { %p1073_p10 = pnand %p1072_p9, %p1071_p2 }
  0x29   : > { %p1078_p0 = por %p1077_p13, %p1076_p12 }
  0x2a   : > { %p1074_p11 = pneg %p1073_p10 }
  0x2c   : > { %p1079_p3 = pnand %p1078_p0, %p1074_p11 }
  0x2e   : > { %1082 = shalt.err (!%p1079_p3)
}
  0x2f   : > { %s1179_s22 = smov 128   ;;  %s1180_s17 = smov 8  }
  0x30   : > { %900 = dma.hbm_to_vmem [thread:$0]  (!%p1324_p7), %s306_s14, 256, %s308_s19, %s296_s20, %s1179_s22, %s1179_s22, %s1180_s17  }
  0x31   : > { %319 = sbr.rel (%p1274_p8) target bundleno = 982 (0x3d6), region = 52  ;;  %s1341_s24 = sand.u32 (!%p1274_p8), 1, %s1164_s28  }
  0x32   : > { %s833_s3 = sshll.u32 (!%p1274_p8), %s1341_s24, 4  ;;  %s322_s5 = scalar_lea.sflag (!%p1274_p8), [#allocation4], %s1341_s24 }
  0x33   : > { %s325_s25 = scalar_lea.vmem (!%p1274_p8), [#allocation3], %s833_s3 }
  0x36   : > { %1143 = dma.done.wait (%p1261_p4), %s322_s5, 256  }
  0x37   : > { %1145 = vsyncadd (%p1261_p4), %s322_s5, 4294967040 }
  0x38   : > { %1147 = dma.done.wait (%p47_p1), [#allocation7], 320  }
  0x39   : > { %1149 = vsyncadd (%p47_p1), [#allocation7], 4294966976 }
  0x3a   : > { %1151 = dma.done.wait (%p47_p1), [#allocation10], 256  }
  0x3b   : > { %1153 = vsyncadd (%p47_p1), [#allocation10], 4294967040  ;;  %vm392_vm0 = vcmask 261120   ;;  %v1359_v0 = vld [vmem:[%s325_s25 + $0x8] sm:$0xff]  ;;  %v1361_v1 = vld [vmem:[%s325_s25] sm:$0xff]  ;;  %v1181_v8 = vmov 32.0  }
  0x3c   : > { %v396_v2 = vsel %vm392_vm0, %v1359_v0, 0.0  ;;  %v393_v3 = vsel %vm392_vm0, %v1361_v1, 0.0  ;;  %v409_v4 = vmul.f32 %v1359_v0, %v1359_v0  ;;  %v408_v5 = vmul.f32 %v1361_v1, %v1361_v1  ;;  %v380_v31 = vld [vmem:[%s1475_s4] sm:$0xff]  ;;  %s870_s13 = sshll.u32 %s1252_s9, 4  ;;  %s373_s25 = scalar_lea.vmem [#allocation11], %s833_s3 }
  0x3d   : > { %397 = vadd.xlane.f32.xlu0 %v396_v2  ;;  %394 = vadd.xlane.f32.xlu1 %v393_v3  ;;  %960 = vrcp.f32 %v1181_v8  ;;  %v1182_v32 = vmov 0   ;;  %v1385_v42 = vld [vmem:[%s1472_s1] sm:$0xf]  ;;  %vm466_vm8 = vcmask 1043456   ;;  %vm462_vm9 = vcmask 64512   ;;  %s717_s5 = scalar_lea.hbm %s1479_s8, %s870_s13  ;;  %s718_s11 = sshll.u32 %s373_s25, 4  ;;  %s719_s11 = int_to_ptr.vmem [resolvable:$true] %s718_s11 }
  0x3e   : > { %v413_v6 = vsel %vm392_vm0, %v409_v4, 0.0  ;;  %v410_v7 = vsel %vm392_vm0, %v408_v5, 0.0  ;;  %957 = vset.pattern.permute.xlu2 %v1182_v32  ;;  %v450_v47 = vperm.slane %v1385_v42, 0  ;;  %v453_v51 = vperm.slane %v1385_v42, 1  ;;  %v382_v62 = vld [vmem:[%s1473_s2] sm:$0xf] }
  0x3f   : > { %459 = vperm.xlu2 %957, %v380_v31   ;;  %v1183_v5 = vmov 1   ;;  %s720_s16 = sshll.u32 %s717_s5, 4  ;;  %s706_s9 = scalar_lea.sflag [#allocation5], %s1341_s24  ;;  %s721_s16 = int_to_ptr.hbm [resolvable:$true] %s720_s16 }
  0x40   : > { %959 = vset.pattern.permute.xlu0 %v1183_v5  ;;  %s1112_s14 = sshra.s32 %s721_s16, 4  ;;  %s1118_s20 = scalar_lea.hbm %s1479_s8, 64  ;;  %s1113_s14 = int_to_ptr.hbm [resolvable:$true] %s1112_s14 }
  0x41   : > { %s1114_s19 = scalar_lea.hbm %s1113_s14, 16  ;;  %p1119_p7 = scmp.lt.s32.totalorder %s1113_s14, %s1479_s8 }
  0x42   : > { %p1115_p1 = scmp.ne.s32.totalorder %s1113_s14, %s1114_s19  ;;  %p1120_p2 = scmp.lt.s32.totalorder %s1118_s20, %s1114_s19 }
  0x43   : > { %v961_v9 = vpop.eup %960 }
  0x44   : > { %v400_v10 = vmul.f32 32.0, %v961_v9  ;;  %vm404_vm1 = vweird.f32 %v961_v9  ;;  %p1116_p4 = pnand %p1115_p1, %p1313_p5  ;;  %p1121_p9 = por %p1120_p2, %p1119_p7 }
  0x45   : > { %414 = vadd.xlane.f32.xlu0 %v413_v6  ;;  %411 = vadd.xlane.f32.xlu1 %v410_v7 }
  0x46   : > { %v401_v11 = vsub.f32 1.0, %v400_v10  ;;  %p1117_p8 = pneg %p1116_p4 }
  0x47   : > { %958 = vset.pattern.permute.xlu2 %v1183_v5 }
  0x48   : > { %v402_v12 = vmul.f32 %v961_v9, %v401_v11  ;;  %494 = vperm.xlu2 %958, %v380_v31   ;;  %p1122_p10 = pnand %p1121_p9, %p1117_p8 }
  0x4a   : > { %v403_v13 = vadd.f32 %v961_v9, %v402_v12 }
  0x4c   : > { %v1373_v16 = vsel %vm404_vm1, %v961_v9, %v403_v13 }
  0x99   : > { %v460_v63 = vpop.permute.xlu2 %459 }
  0xb0   : > { %v398_v14 = vpop.xlane.xlu0 %397  ;;  %v395_v15 = vpop.xlane.xlu1 %394 }
  0xb1   : > { %v406_v17 = vmul.f32 %v1373_v16, %v395_v15  ;;  %v407_v18 = vmul.f32 %v1373_v16, %v398_v14 }
  0xb3   : > { %v418_v19 = vmul.f32 %v406_v17, %v406_v17  ;;  %v419_v22 = vmul.f32 %v407_v18, %v407_v18  ;;  %v425_v45 = vsub.f32 %v1359_v0, %v407_v18  ;;  %v424_v48 = vsub.f32 %v1361_v1, %v406_v17 }
  0xb8   : > { %v415_v20 = vpop.xlane.xlu0 %414  ;;  %v412_v21 = vpop.xlane.xlu1 %411 }
  0xb9   : > { %v417_v23 = vmul.f32 %v415_v20, %v1373_v16  ;;  %v416_v24 = vmul.f32 %v412_v21, %v1373_v16 }
  0xbb   : > { %v421_v25 = vsub.f32 %v417_v23, %v419_v22  ;;  %v420_v26 = vsub.f32 %v416_v24, %v418_v19 }
  0xbd   : > { %v423_v27 = vmax.f32 %v421_v25, 0.0  ;;  %v422_v28 = vmax.f32 %v420_v26, 0.0 }
  0xbf   : > { %v427_v29 = vadd.f32 1e-05, %v423_v27  ;;  %v426_v30 = vadd.f32 1e-05, %v422_v28 }
  0xc1   : > { %962 = vrsqrt.f32 %v427_v29  ;;  %vm444_vm4 = vweird.f32 %v427_v29  ;;  %vm434_vm6 = vweird.f32 %v426_v30 }
  0xc2   : > { %964 = vrsqrt.f32 %v426_v30 }
  0xc7   : > { %v963_v33 = vpop.eup %962 }
  0xc8   : > { %v965_v34 = vpop.eup %964  ;;  %v439_v35 = vmul.f32 %v963_v33, %v427_v29  ;;  %vm445_vm2 = vweird.f32 %v963_v33  ;;  %v383_v29 = vld [vmem:[#allocation6] sm:$0xf] }
  0xc9   : > { %v429_v36 = vmul.f32 %v965_v34, %v426_v30  ;;  %vm435_vm3 = vweird.f32 %v965_v34  ;;  %vm446_vm5 = vmor %vm444_vm4, %vm445_vm2 }
  0xca   : > { %v440_v37 = vmul.f32 %v963_v33, %v439_v35  ;;  %vm436_vm7 = vmor %vm434_vm6, %vm435_vm3 }
  0xcb   : > { %v430_v38 = vmul.f32 %v965_v34, %v429_v36 }
  0xcc   : > { %v441_v39 = vmul.f32 0.5, %v440_v37 }
  0xcd   : > { %v431_v40 = vmul.f32 0.5, %v430_v38 }
  0xce   : > { %v442_v41 = vsub.f32 1.5, %v441_v39 }
  0xcf   : > { %v432_v43 = vsub.f32 1.5, %v431_v40 }
  0xd0   : > { %v443_v44 = vmul.f32 %v963_v33, %v442_v41 }
  0xd1   : > { %v433_v46 = vmul.f32 %v965_v34, %v432_v43 }
  0xd2   : > { %v447_v49 = vsel %vm446_vm5, %v963_v33, %v443_v44  ;;  %v495_v33 = vpop.permute.xlu2 %494 }
  0xd3   : > { %v437_v50 = vsel %vm436_vm7, %v965_v34, %v433_v46  ;;  %v449_v52 = vmul.f32 %v447_v49, %v425_v45 }
  0xd4   : > { %v448_v53 = vmul.f32 %v437_v50, %v424_v48 }
  0xd5   : > { %v452_v54 = vmul.f32 %v450_v47, %v449_v52 }
  0xd6   : > { %v451_v55 = vmul.f32 %v450_v47, %v448_v53 }
  0xd7   : > { %v455_v56 = vadd.f32 %v453_v51, %v452_v54 }
  0xd8   : > { %v454_v57 = vadd.f32 %v453_v51, %v451_v55 }
  0xd9   : > { %v518_v58 = vpack.c.bf16 %v455_v56, %v455_v56  ;;  %v867_v56 = vld [vmem:[#allocation8 + $0x8] sm:$0xff] }
  0xda   : > { %v456_v59 = vpack.c.bf16 %v454_v57, %v454_v57 }
  0xdb   : > { %v520_v60 = vsel %vm466_vm8, %v518_v58, 0  ;;  %v866_v58 = vld [vmem:[#allocation8] sm:$0xff] }
  0xdc   : > { %v468_v61 = vsel %vm466_vm8, %v456_v59, 0  ;;  %529 = vmatpush.bf16.msra.mxu2 %v520_v60 }
  0xdd   : > { %477 = vmatpush.bf16.msra.mxu0 %v468_v61 }
  0xdf   : > { %840 = vmatmul.msk.bf16.vlgmr.msra.gmra.mxu2 %vm462_vm9, %v382_v62 }
  0xe0   : > { %838 = vmatmul.msk.bf16.vlgmr.msra.gmra.mxu0 %vm462_vm9, %v382_v62 }
  0xe1   : > { %644 = vmatpush.bf16.msrb.mxu0 %v867_v56 }
  0xe5   : > { %645 = vmatpush.bf16.msrb.mxu0 %v866_v58 }
 0x15d   : > { %v479_v2 = vpop.f32.mrf.mxu0 }
 0x15e   : > { %v480_v3 = vadd.f32 %v479_v2, %v460_v63 }
 0x160   : > { %v484_v4 = vmul.f32 %v480_v3, %v480_v3  ;;  %v483_v21 = vmul.f32 0.5, %v480_v3 }
 0x162   : > { %v485_v6 = vmul.f32 %v484_v4, %v480_v3  ;;  %v531_v7 = vpop.f32.mrf.mxu2 }
 0x163   : > { %v532_v8 = vadd.f32 %v531_v7, %v460_v63 }
 0x164   : > { %v486_v9 = vmul.f32 0.044715, %v485_v6 }
 0x165   : > { %v536_v10 = vmul.f32 %v532_v8, %v532_v8  ;;  %v481_v11 = vpop.f32.mrf.mxu0  ;;  %v535_v26 = vmul.f32 0.5, %v532_v8 }
 0x166   : > { %v487_v12 = vadd.f32 %v486_v9, %v480_v3 }
 0x167   : > { %v537_v13 = vmul.f32 %v536_v10, %v532_v8 }
 0x168   : > { %v488_v14 = vmul.f32 0.7978846, %v487_v12 }
 0x169   : > { %v538_v15 = vmul.f32 0.044715, %v537_v13 }
 0x16a   : > { %v533_v17 = vpop.f32.mrf.mxu2  ;;  %966 = vtanh.f32 %v488_v14 }
 0x16b   : > { %v539_v18 = vadd.f32 %v538_v15, %v532_v8 }
 0x16d   : > { %v540_v19 = vmul.f32 0.7978846, %v539_v18  ;;  %v615_v18 = vperm.slane %v1385_v42, 2 }
 0x16f   : > { %968 = vtanh.f32 %v540_v19 }
 0x170   : > { %v967_v20 = vpop.eup %966 }
 0x171   : > { %v490_v22 = vadd.f32 1.0, %v967_v20 }
 0x173   : > { %v491_v23 = vmul.f32 %v490_v22, %v483_v21 }
 0x175   : > { %v969_v24 = vpop.eup %968  ;;  %v492_v25 = vpack.c.bf16 %v491_v23, %v491_v23 }
 0x176   : > { %v542_v27 = vadd.f32 1.0, %v969_v24 }
 0x177   : > { %v501_v28 = vsel %vm466_vm8, %v492_v25, 0  ;;  %v618_v25 = vperm.slane %v1385_v42, 3 }
 0x178   : > { %510 = vmatpush.bf16.msra.mxu1 %v501_v28  ;;  %v543_v30 = vmul.f32 %v542_v27, %v535_v26 }
 0x17a   : > { %v544_v31 = vpack.c.bf16 %v543_v30, %v543_v30  ;;  %v381_v30 = vld [vmem:[%s1478_s7] sm:$0x3] }
 0x17b   : > { %839 = vmatmul.msk.bf16.vlgmr.msra.gmra.mxu1 %vm462_vm9, %v383_v29 }
 0x17c   : > { %v546_v32 = vsel %vm466_vm8, %v544_v31, 0  ;;  %v869_v31 = vld [vmem:[#allocation9 + $0x8] sm:$0xff] }
 0x17d   : > { %555 = vmatpush.bf16.msra.mxu3 %v546_v32  ;;  %693 = vmatpush.bf16.msrb.mxu1 %v869_v31  ;;  %v868_v32 = vld [vmem:[#allocation9] sm:$0xff] }
 0x180   : > { %841 = vmatmul.msk.bf16.vlgmr.msra.gmra.mxu3 %vm462_vm9, %v383_v29 }
 0x181   : > { %694 = vmatpush.bf16.msrb.mxu1 %v868_v32 }
 0x1f8   : > { %v512_v34 = vpop.f32.mrf.mxu1 }
 0x1f9   : > { %v513_v35 = vadd.f32 %v512_v34, %v495_v33 }
 0x1fb   : > { %v516_v36 = vadd.f32 %v513_v35, %v1361_v1 }
 0x1fd   : > { %517 = vst.msk [vmem:[#allocation2] sm:$0xff] %vm392_vm0, %v516_v36 }
 0x200   : > { %v514_v37 = vpop.f32.mrf.mxu1 }
 0x203   : > { %v557_v38 = vpop.f32.mrf.mxu3 }
 0x204   : > { %v558_v39 = vadd.f32 %v557_v38, %v495_v33  ;;  %v1404_v40 = vld [vmem:[#allocation2] sm:$0xff]  ;;  %v622_v33 = vperm.slane %v381_v30, 0 }
 0x205   : > { %v565_v41 = vsel %vm392_vm0, %v1404_v40, 0.0  ;;  %v573_v43 = vmul.f32 %v1404_v40, %v1404_v40 }
 0x206   : > { %v561_v44 = vadd.f32 %v558_v39, %v1359_v0  ;;  %566 = vadd.xlane.f32.xlu0 %v565_v41 }
 0x207   : > { %v575_v45 = vsel %vm392_vm0, %v573_v43, 0.0 }
 0x208   : > { %562 = vst.msk [vmem:[#allocation2 + $0x8] sm:$0xff] %vm392_vm0, %v561_v44  ;;  %576 = vadd.xlane.f32.xlu2 %v575_v45 }
 0x20b   : > { %v559_v1 = vpop.f32.mrf.mxu3 }
 0x20f   : > { %v1413_v46 = vld [vmem:[#allocation2 + $0x8] sm:$0xff] }
 0x210   : > { %v568_v47 = vsel %vm392_vm0, %v1413_v46, 0.0  ;;  %v574_v48 = vmul.f32 %v1413_v46, %v1413_v46 }
 0x211   : > { %569 = vadd.xlane.f32.xlu1 %v568_v47 }
 0x212   : > { %v578_v49 = vsel %vm392_vm0, %v574_v48, 0.0 }
 0x213   : > { %579 = vadd.xlane.f32.xlu0 %v578_v49 }
 0x279   : > { %v567_v0 = vpop.xlane.xlu0 %566 }
 0x27a   : > { %v571_v50 = vmul.f32 %v567_v0, %v1373_v16 }
 0x27b   : > { %v577_v51 = vpop.xlane.xlu2 %576 }
 0x27c   : > { %v583_v52 = vmul.f32 %v571_v50, %v571_v50  ;;  %v581_v53 = vmul.f32 %v577_v51, %v1373_v16 }
 0x27e   : > { %v585_v54 = vsub.f32 %v581_v53, %v583_v52 }
 0x280   : > { %v587_v55 = vmax.f32 %v585_v54, 0.0 }
 0x282   : > { %v591_v57 = vadd.f32 1e-05, %v587_v55 }
 0x284   : > { %970 = vrsqrt.f32 %v591_v57  ;;  %v570_v59 = vpop.xlane.xlu1 %569  ;;  %vm599_vm10 = vweird.f32 %v591_v57 }
 0x285   : > { %v572_v60 = vmul.f32 %v570_v59, %v1373_v16 }
 0x286   : > { %v580_v61 = vpop.xlane.xlu0 %579 }
 0x287   : > { %v584_v62 = vmul.f32 %v572_v60, %v572_v60  ;;  %v582_v63 = vmul.f32 %v580_v61, %v1373_v16  ;;  %v589_v16 = vsub.f32 %v1404_v40, %v571_v50  ;;  %v590_v21 = vsub.f32 %v1413_v46, %v572_v60 }
 0x289   : > { %v586_v2 = vsub.f32 %v582_v63, %v584_v62 }
 0x28a   : > { %v971_v3 = vpop.eup %970 }
 0x28b   : > { %v594_v4 = vmul.f32 %v971_v3, %v591_v57  ;;  %v588_v5 = vmax.f32 %v586_v2, 0.0  ;;  %vm600_vm11 = vweird.f32 %v971_v3  ;;  %v671_v57 = vperm.slane %v381_v30, 1 }
 0x28c   : > { %vm601_vm12 = vmor %vm599_vm10, %vm600_vm11 }
 0x28d   : > { %v595_v6 = vmul.f32 %v971_v3, %v594_v4  ;;  %v592_v7 = vadd.f32 1e-05, %v588_v5 }
 0x28f   : > { %v596_v8 = vmul.f32 0.5, %v595_v6  ;;  %972 = vrsqrt.f32 %v592_v7  ;;  %vm609_vm14 = vweird.f32 %v592_v7 }
 0x291   : > { %v597_v9 = vsub.f32 1.5, %v596_v8 }
 0x293   : > { %v598_v11 = vmul.f32 %v971_v3, %v597_v9 }
 0x295   : > { %v973_v10 = vpop.eup %972  ;;  %v602_v14 = vsel %vm601_vm12, %v971_v3, %v598_v11 }
 0x296   : > { %v604_v12 = vmul.f32 %v973_v10, %v592_v7  ;;  %vm610_vm13 = vweird.f32 %v973_v10  ;;  %v613_v19 = vmul.f32 %v602_v14, %v589_v16 }
 0x297   : > { %vm611_vm15 = vmor %vm609_vm14, %vm610_vm13 }
 0x298   : > { %v605_v13 = vmul.f32 %v973_v10, %v604_v12  ;;  %v616_v24 = vmul.f32 %v615_v18, %v613_v19 }
 0x29a   : > { %v606_v15 = vmul.f32 0.5, %v605_v13  ;;  %v619_v27 = vadd.f32 %v618_v25, %v616_v24 }
 0x29c   : > { %v607_v17 = vsub.f32 1.5, %v606_v15 }
 0x29e   : > { %v608_v20 = vmul.f32 %v973_v10, %v607_v17 }
 0x2a0   : > { %v612_v22 = vsel %vm611_vm15, %v973_v10, %v608_v20 }
 0x2a1   : > { %v614_v23 = vmul.f32 %v612_v22, %v590_v21 }
 0x2a3   : > { %v617_v26 = vmul.f32 %v615_v18, %v614_v23 }
 0x2a5   : > { %v620_v28 = vadd.f32 %v618_v25, %v617_v26 }
 0x2a7   : > { %v621_v29 = vpack.c.bf16 %v620_v28, %v619_v27 }
 0x2a9   : > { %850 = vmatmul.msk.bf16.vlgmr.msrb.gmra.mxu0 %vm392_vm0, %v621_v29 }
 0x326   : > { %v647_v34 = vpop.f32.mrf.mxu0 }
 0x327   : > { %v648_v35 = vadd.f32 %v647_v34, %v622_v33 }
 0x329   : > { %v654_v36 = vmul.f32 %v648_v35, %v648_v35  ;;  %v652_v51 = vmul.f32 0.5, %v648_v35 }
 0x32b   : > { %v656_v37 = vmul.f32 %v654_v36, %v648_v35 }
 0x32d   : > { %v658_v42 = vmul.f32 0.044715, %v656_v37 }
 0x32e   : > { %v649_v38 = vpop.f32.mrf.mxu0 }
 0x32f   : > { %v660_v39 = vadd.f32 %v658_v42, %v648_v35  ;;  %v650_v41 = vadd.f32 %v649_v38, %v622_v33 }
 0x331   : > { %v655_v43 = vmul.f32 %v650_v41, %v650_v41  ;;  %v662_v44 = vmul.f32 0.7978846, %v660_v39  ;;  %v653_v52 = vmul.f32 0.5, %v650_v41 }
 0x333   : > { %v657_v45 = vmul.f32 %v655_v43, %v650_v41  ;;  %974 = vtanh.f32 %v662_v44 }
 0x335   : > { %v659_v1 = vmul.f32 0.044715, %v657_v45 }
 0x337   : > { %v661_v47 = vadd.f32 %v659_v1, %v650_v41 }
 0x339   : > { %v663_v48 = vmul.f32 0.7978846, %v661_v47  ;;  %v975_v49 = vpop.eup %974 }
 0x33a   : > { %v666_v0 = vadd.f32 1.0, %v975_v49 }
 0x33b   : > { %976 = vtanh.f32 %v663_v48 }
 0x33c   : > { %v668_v54 = vmul.f32 %v666_v0, %v652_v51 }
 0x341   : > { %v977_v50 = vpop.eup %976 }
 0x342   : > { %v667_v53 = vadd.f32 1.0, %v977_v50 }
 0x344   : > { %v669_v55 = vmul.f32 %v667_v53, %v653_v52 }
 0x346   : > { %v670_v56 = vpack.c.bf16 %v669_v55, %v668_v54 }
 0x348   : > { %859 = vmatmul.msk.bf16.vlgmr.msrb.gmra.mxu1 %vm392_vm0, %v670_v56 }
 0x3c5   : > { %v696_v58 = vpop.f32.mrf.mxu1 }
 0x3c6   : > { %v697_v59 = vadd.f32 %v696_v58, %v671_v57 }
 0x3c8   : > { %v701_v60 = vadd.f32 %v697_v59, %v1404_v40 }
 0x3ca   : > { %703 = vst.msk [vmem:[%s373_s25] sm:$0xff] %vm392_vm0, %v701_v60 }
 0x3cd   : > { %v698_v61 = vpop.f32.mrf.mxu1 }
 0x3ce   : > { %v699_v62 = vadd.f32 %v698_v61, %v671_v57 }
 0x3d0   : > { %v702_v63 = vadd.f32 %v699_v62, %v1413_v46 }
 0x3d2   : > { %704 = vst.msk [vmem:[%s373_s25 + $0x8] sm:$0xff] %vm392_vm0, %v702_v63 }
 0x3d3   : > { %1125 = shalt.err (!%p1122_p10)
}
 0x3d4   : > { %s1184_s24 = smov 128   ;;  %s1185_s13 = smov 8  }
 0x3d5   : > { %885 = dma.vmem_to_hbm [thread:$0]  (%p1313_p5), %s719_s11, 256, %s721_s16, %s706_s9, %s1184_s24, %s1184_s24, %s1185_s13  }
 0x3d6 PF: > { %p912_p11 = scmp.ge.s32.totalorder %s1172_s30, 2  ;;  %s735_s22 = sand.u32 1, %s1160_s27  }
 0x3d7   : > { %s736_s17 = scalar_lea.sflag [#allocation5], %s735_s22 }
 0x3d8   : > { %p902_p12 = pnand %p912_p11, %p1266_p6 }
 0x3da   : > { %p903_p13 = pneg %p902_p12 }
 0x3dc   : > { %1155 = dma.done.wait (%p903_p13), %s736_s17, 256  }
 0x3dd   : > { %1157 = vsyncadd (%p903_p13), %s736_s17, 4294967040  ;;  %p23_p0 = scmp.ge.s32.totalorder %s1299_s15, 6   ;;  %s1490_s27 = smov %s1164_s28 }
 0x3de   : > { %s1491_s28 = smov %s1168_s29  ;;  %s1492_s29 = smov %s1309_s21 }
 0x3df   : > { %s1493_s30 = smov %s1299_s15  ;;  %25 = sbr.rel (!%p23_p0) target bundleno = 10 (0xa), region = 109 }
 0x3e4   :  { %742 = vsyncpa [#allocation4], 1 }
 0x3e5   :  { %744 = vsyncpa [#allocation4 + $0x1], 1 }
 0x3e6   :  { %745 = vsyncpa [#allocation7], 1 }
 0x3e7   :  { %746 = vsyncpa [#allocation10], 1 }
 0x3e8   :  { %747 = vsyncpa [#allocation5], 1 }
 0x3e9   :  { %749 = vsyncpa [#allocation5 + $0x1], 1 }

// kernel: tpu_custom_call.1
= control target key start
LH: loop header
LB: loop body
LE: loop exit
PB: predicated region body
PF: predicated region fallthrough
CT: control target
= control target key end

     0   :  { %s1471_s0 = inlined_call_operand.hbm [shape: f32[8,8,32], index: 0, kind: input, shape index: {}]   ;;  %s1472_s1 = inlined_call_operand.vmem [shape: f32[4,32], index: 1, kind: input, shape index: {}]   ;;  %s1473_s2 = inlined_call_operand.vmem [shape: bf16[8,8], index: 2, kind: input, shape index: {}]   ;;  %s1474_s3 = inlined_call_operand.hbm [shape: bf16[8,8], index: 3, kind: input, shape index: {}]   ;;  %s1475_s4 = inlined_call_operand.vmem [shape: f32[8,2], index: 4, kind: input, shape index: {}]   ;;  %s1476_s5 = inlined_call_operand.hbm [shape: bf16[32,32], index: 5, kind: input, shape index: {}]   ;;  %s1477_s6 = inlined_call_operand.hbm [shape: bf16[32,32], index: 6, kind: input, shape index: {}]   ;;  %s1478_s7 = inlined_call_operand.vmem [shape: f32[2,32], index: 7, kind: input, shape index: {}]   ;;  %s1479_s8 = inlined_call_operand.hbm [shape: f32[8,8,32], index: 8, kind: output, shape index: {}]  }
   0x1   :  { %1480 = sst [smem:[#allocation16_spill]] %s1474_s3 }
   0x2   :  { %1481 = sst [smem:[#allocation17_spill]] %s1476_s5 }
   0x3   :  { %13 = vsyncpa [#allocation4], 0 }
   0x4   :  { %15 = vsyncpa [#allocation4 + $0x1], 0 }
   0x5   :  { %16 = vsyncpa [#allocation7], 0 }
   0x6   :  { %17 = vsyncpa [#allocation10], 0 }
   0x7   :  { %18 = vsyncpa [#allocation5], 0 }
   0x8   :  { %20 = vsyncpa [#allocation5 + $0x1], 0  ;;  %s1231_s27 = smov 0   ;;  %s1233_s28 = smov 0  }
   0x9   :  { %s1235_s29 = smov 0   ;;  %s1237_s30 = smov 0  }
   0xa LB: > { %s1252_s9 = sadd.s32 4294967295, %s1172_s30   ;;  %s823_s10 = sadd.s32 4294967294, %s1172_s30   ;;  %s1172_s30 = sphi %s1237_s30, %s1493_s30   ;;  %s1168_s29 = sphi %s1235_s29, %s1492_s29   ;;  %s1164_s28 = sphi %s1233_s28, %s1491_s28   ;;  %s1160_s27 = sphi %s1231_s27, %s1490_s27  }
   0xb   : > { %p46_p0 = scmp.ne.s32.totalorder %s1164_s28, %s1160_s27  ;;  %p47_p1 = scmp.eq.s32.totalorder %s1252_s9, 0 }
   0xc   : > { %p217_p2 = scmp.eq.s32.totalorder %s1252_s9, 3  ;;  %p223_p3 = scmp.eq.s32.totalorder %s823_s10, 3 }
   0xd   : > { %p1261_p4 = por %p47_p1, %p46_p0  ;;  %p824_p5 = scmp.ge.s32.totalorder %s1172_s30, 1 }
   0xe   : > { %p1266_p6 = por %p223_p3, %p46_p0  ;;  %p230_p7 = scmp.lt.s32.totalorder %s1172_s30, 5 }
   0xf   : > { %s1484_s3 = sld [smem:[#allocation16_spill]]  ;;  %s1174_s17 = smov [#allocation6]  }
  0x10   : > { %p1274_p8 = pnand %p824_p5, %p230_p7  ;;  %s250_s18 = sshll.u32 %s1174_s17, 4  ;;  %s251_s18 = int_to_ptr.vmem [resolvable:$true] %s250_s18 }
  0x11   : > { %s1486_s5 = sld [smem:[#allocation17_spill]]  ;;  %s1175_s23 = smov [#allocation8]  }
  0x12   : > { %p887_p9 = pneg %p1274_p8  ;;  %s264_s24 = sshll.u32 %s1175_s23, 4  ;;  %s265_s24 = int_to_ptr.vmem [resolvable:$true] %s264_s24 }
  0x13   : > { %s1176_s25 = smov 64   ;;  %s1177_s26 = smov 4  }
  0x14   : > { %p1285_p10 = pnand %p887_p9, %p47_p1  ;;  %s276_s14 = sshll.u32 %s1477_s6, 4  ;;  %s277_s14 = int_to_ptr.hbm [resolvable:$true] %s276_s14 }
  0x15   : > { %s248_s15 = sshll.u32 %s1484_s3, 4  ;;  %s1178_s17 = smov [#allocation9]   ;;  %s249_s15 = int_to_ptr.hbm [resolvable:$true] %s248_s15 }
  0x16   : > { %890 = dma.hbm_to_vmem [thread:$0]  (!%p1285_p10), %s249_s15, 64, %s251_s18, [#allocation7]  }
  0x17   : > { %s262_s21 = sshll.u32 %s1486_s5, 4  ;;  %s278_s19 = sshll.u32 %s1178_s17, 4  ;;  %s263_s21 = int_to_ptr.hbm [resolvable:$true] %s262_s21  ;;  %s279_s19 = int_to_ptr.vmem [resolvable:$true] %s278_s19 }
  0x18   : > { %893 = dma.hbm_to_vmem [thread:$0]  (!%p1285_p10), %s263_s21, 256, %s265_s24, [#allocation7], %s1176_s25, %s1176_s25, %s1177_s26  }
  0x19   : > { %896 = dma.hbm_to_vmem [thread:$0]  (!%p1285_p10), %s277_s14, 256, %s279_s19, [#allocation10], %s1176_s25, %s1176_s25, %s1177_s26  }
  0x1a   : > { %s1299_s15 = sadd.s32 1, %s1172_s30   ;;  %s33_s20 = sadd.s32 1, %s1168_s29 }
  0x1b   : > { %s30_s18 = ssub.s32 %s1172_s30, %s1299_s15  ;;  %p40_p12 = scmp.ne.s32.totalorder %s1168_s29, %s1164_s28 }
  0x1c   : > { %p31_p11 = scmp.eq.s32.totalorder %s30_s18, 0  ;;  %p41_p13 = scmp.eq.s32.totalorder %s1172_s30, 0 }
  0x1d   : > { %p908_p0 = scmp.lt.s32.totalorder %s1172_s30, 4  ;;  %p1313_p5 = por %p217_p2, %p40_p12 }
  0x1e   : > { %s1309_s21 = scalar_select %p31_p11, %s1168_s29, %s33_s20  }
  0x1f   : > { %p42_p3 = por %p41_p13, %p40_p12  ;;  %s295_s22 = sand.u32 1, %s1168_s29  }
  0x20   : > { %s865_s24 = sshll.u32 %s1172_s30, 4  ;;  %s829_s25 = sshll.u32 %s295_s22, 4 }
  0x21   : > { %s304_s13 = scalar_lea.hbm %s1471_s0, %s865_s24  ;;  %s299_s17 = scalar_lea.vmem [#allocation3], %s829_s25 }
  0x22   : > { %s305_s14 = sshll.u32 %s304_s13, 4  ;;  %s307_s19 = sshll.u32 %s299_s17, 4  ;;  %s306_s14 = int_to_ptr.hbm [resolvable:$true] %s305_s14  ;;  %s308_s19 = int_to_ptr.vmem [resolvable:$true] %s307_s19 }
  0x23   : > { %p1324_p7 = pnand %p908_p0, %p42_p3  ;;  %s296_s20 = scalar_lea.sflag [#allocation4], %s295_s22 }
  0x24   : > { %s1068_s3 = sshra.s32 %s306_s14, 4  ;;  %s1075_s26 = scalar_lea.hbm %s1471_s0, 64  ;;  %s1069_s3 = int_to_ptr.hbm [resolvable:$true] %s1068_s3 }
  0x25   : > { %s1070_s5 = scalar_lea.hbm %s1069_s3, 16  ;;  %p1072_p9 = pneg %p1324_p7 }
  0x26   : > { %p1071_p2 = scmp.ne.s32.totalorder %s1069_s3, %s1070_s5  ;;  %p1076_p12 = scmp.lt.s32.totalorder %s1069_s3, %s1471_s0 }
  0x27   : > { %p1077_p13 = scmp.lt.s32.totalorder %s1075_s26, %s1070_s5 }
  0x28   : > { %p1073_p10 = pnand %p1072_p9, %p1071_p2 }
  0x29   : > { %p1078_p0 = por %p1077_p13, %p1076_p12 }
  0x2a   : > { %p1074_p11 = pneg %p1073_p10 }
  0x2c   : > { %p1079_p3 = pnand %p1078_p0, %p1074_p11 }
  0x2e   : > { %1082 = shalt.err (!%p1079_p3)
}
  0x2f   : > { %s1179_s22 = smov 128   ;;  %s1180_s17 = smov 8  }
  0x30   : > { %900 = dma.hbm_to_vmem [thread:$0]  (!%p1324_p7), %s306_s14, 256, %s308_s19, %s296_s20, %s1179_s22, %s1179_s22, %s1180_s17  }
  0x31   : > { %319 = sbr.rel (%p1274_p8) target bundleno = 982 (0x3d6), region = 52  ;;  %s1341_s24 = sand.u32 (!%p1274_p8), 1, %s1164_s28  }
  0x32   : > { %s833_s3 = sshll.u32 (!%p1274_p8), %s1341_s24, 4  ;;  %s322_s5 = scalar_lea.sflag (!%p1274_p8), [#allocation4], %s1341_s24 }
  0x33   : > { %s325_s25 = scalar_lea.vmem (!%p1274_p8), [#allocation3], %s833_s3 }
  0x36   : > { %1143 = dma.done.wait (%p1261_p4), %s322_s5, 256  }
  0x37   : > { %1145 = vsyncadd (%p1261_p4), %s322_s5, 4294967040 }
  0x38   : > { %1147 = dma.done.wait (%p47_p1), [#allocation7], 320  }
  0x39   : > { %1149 = vsyncadd (%p47_p1), [#allocation7], 4294966976 }
  0x3a   : > { %1151 = dma.done.wait (%p47_p1), [#allocation10], 256  }
  0x3b   : > { %1153 = vsyncadd (%p47_p1), [#allocation10], 4294967040  ;;  %vm392_vm0 = vcmask 261120   ;;  %v1359_v0 = vld [vmem:[%s325_s25 + $0x8] sm:$0xff]  ;;  %v1361_v1 = vld [vmem:[%s325_s25] sm:$0xff]  ;;  %v1181_v8 = vmov 32.0  }
  0x3c   : > { %v396_v2 = vsel %vm392_vm0, %v1359_v0, 0.0  ;;  %v393_v3 = vsel %vm392_vm0, %v1361_v1, 0.0  ;;  %v409_v4 = vmul.f32 %v1359_v0, %v1359_v0  ;;  %v408_v5 = vmul.f32 %v1361_v1, %v1361_v1  ;;  %v380_v31 = vld [vmem:[%s1475_s4] sm:$0xff]  ;;  %s870_s13 = sshll.u32 %s1252_s9, 4  ;;  %s373_s25 = scalar_lea.vmem [#allocation11], %s833_s3 }
  0x3d   : > { %397 = vadd.xlane.f32.xlu0 %v396_v2  ;;  %394 = vadd.xlane.f32.xlu1 %v393_v3  ;;  %960 = vrcp.f32 %v1181_v8  ;;  %v1182_v32 = vmov 0   ;;  %v1385_v42 = vld [vmem:[%s1472_s1] sm:$0xf]  ;;  %vm466_vm8 = vcmask 1043456   ;;  %vm462_vm9 = vcmask 64512   ;;  %s717_s5 = scalar_lea.hbm %s1479_s8, %s870_s13  ;;  %s718_s11 = sshll.u32 %s373_s25, 4  ;;  %s719_s11 = int_to_ptr.vmem [resolvable:$true] %s718_s11 }
  0x3e   : > { %v413_v6 = vsel %vm392_vm0, %v409_v4, 0.0  ;;  %v410_v7 = vsel %vm392_vm0, %v408_v5, 0.0  ;;  %957 = vset.pattern.permute.xlu2 %v1182_v32  ;;  %v450_v47 = vperm.slane %v1385_v42, 0  ;;  %v453_v51 = vperm.slane %v1385_v42, 1  ;;  %v382_v62 = vld [vmem:[%s1473_s2] sm:$0xf] }
  0x3f   : > { %459 = vperm.xlu2 %957, %v380_v31   ;;  %v1183_v5 = vmov 1   ;;  %s720_s16 = sshll.u32 %s717_s5, 4  ;;  %s706_s9 = scalar_lea.sflag [#allocation5], %s1341_s24  ;;  %s721_s16 = int_to_ptr.hbm [resolvable:$true] %s720_s16 }
  0x40   : > { %959 = vset.pattern.permute.xlu0 %v1183_v5  ;;  %s1112_s14 = sshra.s32 %s721_s16, 4  ;;  %s1118_s20 = scalar_lea.hbm %s1479_s8, 64  ;;  %s1113_s14 = int_to_ptr.hbm [resolvable:$true] %s1112_s14 }
  0x41   : > { %s1114_s19 = scalar_lea.hbm %s1113_s14, 16  ;;  %p1119_p7 = scmp.lt.s32.totalorder %s1113_s14, %s1479_s8 }
  0x42   : > { %p1115_p1 = scmp.ne.s32.totalorder %s1113_s14, %s1114_s19  ;;  %p1120_p2 = scmp.lt.s32.totalorder %s1118_s20, %s1114_s19 }
  0x43   : > { %v961_v9 = vpop.eup %960 }
  0x44   : > { %v400_v10 = vmul.f32 32.0, %v961_v9  ;;  %vm404_vm1 = vweird.f32 %v961_v9  ;;  %p1116_p4 = pnand %p1115_p1, %p1313_p5  ;;  %p1121_p9 = por %p1120_p2, %p1119_p7 }
  0x45   : > { %414 = vadd.xlane.f32.xlu0 %v413_v6  ;;  %411 = vadd.xlane.f32.xlu1 %v410_v7 }
  0x46   : > { %v401_v11 = vsub.f32 1.0, %v400_v10  ;;  %p1117_p8 = pneg %p1116_p4 }
  0x47   : > { %958 = vset.pattern.permute.xlu2 %v1183_v5 }
  0x48   : > { %v402_v12 = vmul.f32 %v961_v9, %v401_v11  ;;  %494 = vperm.xlu2 %958, %v380_v31   ;;  %p1122_p10 = pnand %p1121_p9, %p1117_p8 }
  0x4a   : > { %v403_v13 = vadd.f32 %v961_v9, %v402_v12 }
  0x4c   : > { %v1373_v16 = vsel %vm404_vm1, %v961_v9, %v403_v13 }
  0x99   : > { %v460_v63 = vpop.permute.xlu2 %459 }
  0xb0   : > { %v398_v14 = vpop.xlane.xlu0 %397  ;;  %v395_v15 = vpop.xlane.xlu1 %394 }
  0xb1   : > { %v406_v17 = vmul.f32 %v1373_v16, %v395_v15  ;;  %v407_v18 = vmul.f32 %v1373_v16, %v398_v14 }
  0xb3   : > { %v418_v19 = vmul.f32 %v406_v17, %v406_v17  ;;  %v419_v22 = vmul.f32 %v407_v18, %v407_v18  ;;  %v425_v45 = vsub.f32 %v1359_v0, %v407_v18  ;;  %v424_v48 = vsub.f32 %v1361_v1, %v406_v17 }
  0xb8   : > { %v415_v20 = vpop.xlane.xlu0 %414  ;;  %v412_v21 = vpop.xlane.xlu1 %411 }
  0xb9   : > { %v417_v23 = vmul.f32 %v415_v20, %v1373_v16  ;;  %v416_v24 = vmul.f32 %v412_v21, %v1373_v16 }
  0xbb   : > { %v421_v25 = vsub.f32 %v417_v23, %v419_v22  ;;  %v420_v26 = vsub.f32 %v416_v24, %v418_v19 }
  0xbd   : > { %v423_v27 = vmax.f32 %v421_v25, 0.0  ;;  %v422_v28 = vmax.f32 %v420_v26, 0.0 }
  0xbf   : > { %v427_v29 = vadd.f32 1e-05, %v423_v27  ;;  %v426_v30 = vadd.f32 1e-05, %v422_v28 }
  0xc1   : > { %962 = vrsqrt.f32 %v427_v29  ;;  %vm444_vm4 = vweird.f32 %v427_v29  ;;  %vm434_vm6 = vweird.f32 %v426_v30 }
  0xc2   : > { %964 = vrsqrt.f32 %v426_v30 }
  0xc7   : > { %v963_v33 = vpop.eup %962 }
  0xc8   : > { %v965_v34 = vpop.eup %964  ;;  %v439_v35 = vmul.f32 %v963_v33, %v427_v29  ;;  %vm445_vm2 = vweird.f32 %v963_v33  ;;  %v383_v29 = vld [vmem:[#allocation6] sm:$0xf] }
  0xc9   : > { %v429_v36 = vmul.f32 %v965_v34, %v426_v30  ;;  %vm435_vm3 = vweird.f32 %v965_v34  ;;  %vm446_vm5 = vmor %vm444_vm4, %vm445_vm2 }
  0xca   : > { %v440_v37 = vmul.f32 %v963_v33, %v439_v35  ;;  %vm436_vm7 = vmor %vm434_vm6, %vm435_vm3 }
  0xcb   : > { %v430_v38 = vmul.f32 %v965_v34, %v429_v36 }
  0xcc   : > { %v441_v39 = vmul.f32 0.5, %v440_v37 }
  0xcd   : > { %v431_v40 = vmul.f32 0.5, %v430_v38 }
  0xce   : > { %v442_v41 = vsub.f32 1.5, %v441_v39 }
  0xcf   : > { %v432_v43 = vsub.f32 1.5, %v431_v40 }
  0xd0   : > { %v443_v44 = vmul.f32 %v963_v33, %v442_v41 }
  0xd1   : > { %v433_v46 = vmul.f32 %v965_v34, %v432_v43 }
  0xd2   : > { %v447_v49 = vsel %vm446_vm5, %v963_v33, %v443_v44  ;;  %v495_v33 = vpop.permute.xlu2 %494 }
  0xd3   : > { %v437_v50 = vsel %vm436_vm7, %v965_v34, %v433_v46  ;;  %v449_v52 = vmul.f32 %v447_v49, %v425_v45 }
  0xd4   : > { %v448_v53 = vmul.f32 %v437_v50, %v424_v48 }
  0xd5   : > { %v452_v54 = vmul.f32 %v450_v47, %v449_v52 }
  0xd6   : > { %v451_v55 = vmul.f32 %v450_v47, %v448_v53 }
  0xd7   : > { %v455_v56 = vadd.f32 %v453_v51, %v452_v54 }
  0xd8   : > { %v454_v57 = vadd.f32 %v453_v51, %v451_v55 }
  0xd9   : > { %v518_v58 = vpack.c.bf16 %v455_v56, %v455_v56  ;;  %v867_v56 = vld [vmem:[#allocation8 + $0x8] sm:$0xff] }
  0xda   : > { %v456_v59 = vpack.c.bf16 %v454_v57, %v454_v57 }
  0xdb   : > { %v520_v60 = vsel %vm466_vm8, %v518_v58, 0  ;;  %v866_v58 = vld [vmem:[#allocation8] sm:$0xff] }
  0xdc   : > { %v468_v61 = vsel %vm466_vm8, %v456_v59, 0  ;;  %529 = vmatpush.bf16.msra.mxu2 %v520_v60 }
  0xdd   : > { %477 = vmatpush.bf16.msra.mxu0 %v468_v61 }
  0xdf   : > { %840 = vmatmul.msk.bf16.vlgmr.msra.gmra.mxu2 %vm462_vm9, %v382_v62 }
  0xe0   : > { %838 = vmatmul.msk.bf16.vlgmr.msra.gmra.mxu0 %vm462_vm9, %v382_v62 }
  0xe1   : > { %644 = vmatpush.bf16.msrb.mxu0 %v867_v56 }
  0xe5   : > { %645 = vmatpush.bf16.msrb.mxu0 %v866_v58 }
 0x15d   : > { %v479_v2 = vpop.f32.mrf.mxu0 }
 0x15e   : > { %v480_v3 = vadd.f32 %v479_v2, %v460_v63 }
 0x160   : > { %v484_v4 = vmul.f32 %v480_v3, %v480_v3  ;;  %v483_v21 = vmul.f32 0.5, %v480_v3 }
 0x162   : > { %v485_v6 = vmul.f32 %v484_v4, %v480_v3  ;;  %v531_v7 = vpop.f32.mrf.mxu2 }
 0x163   : > { %v532_v8 = vadd.f32 %v531_v7, %v460_v63 }
 0x164   : > { %v486_v9 = vmul.f32 0.044715, %v485_v6 }
 0x165   : > { %v536_v10 = vmul.f32 %v532_v8, %v532_v8  ;;  %v481_v11 = vpop.f32.mrf.mxu0  ;;  %v535_v26 = vmul.f32 0.5, %v532_v8 }
 0x166   : > { %v487_v12 = vadd.f32 %v486_v9, %v480_v3 }
 0x167   : > { %v537_v13 = vmul.f32 %v536_v10, %v532_v8 }
 0x168   : > { %v488_v14 = vmul.f32 0.7978846, %v487_v12 }
 0x169   : > { %v538_v15 = vmul.f32 0.044715, %v537_v13 }
 0x16a   : > { %v533_v17 = vpop.f32.mrf.mxu2  ;;  %966 = vtanh.f32 %v488_v14 }
 0x16b   : > { %v539_v18 = vadd.f32 %v538_v15, %v532_v8 }
 0x16d   : > { %v540_v19 = vmul.f32 0.7978846, %v539_v18  ;;  %v615_v18 = vperm.slane %v1385_v42, 2 }
 0x16f   : > { %968 = vtanh.f32 %v540_v19 }
 0x170   : > { %v967_v20 = vpop.eup %966 }
 0x171   : > { %v490_v22 = vadd.f32 1.0, %v967_v20 }
 0x173   : > { %v491_v23 = vmul.f32 %v490_v22, %v483_v21 }
 0x175   : > { %v969_v24 = vpop.eup %968  ;;  %v492_v25 = vpack.c.bf16 %v491_v23, %v491_v23 }
 0x176   : > { %v542_v27 = vadd.f32 1.0, %v969_v24 }
 0x177   : > { %v501_v28 = vsel %vm466_vm8, %v492_v25, 0  ;;  %v618_v25 = vperm.slane %v1385_v42, 3 }
 0x178   : > { %510 = vmatpush.bf16.msra.mxu1 %v501_v28  ;;  %v543_v30 = vmul.f32 %v542_v27, %v535_v26 }
 0x17a   : > { %v544_v31 = vpack.c.bf16 %v543_v30, %v543_v30  ;;  %v381_v30 = vld [vmem:[%s1478_s7] sm:$0x3] }
 0x17b   : > { %839 = vmatmul.msk.bf16.vlgmr.msra.gmra.mxu1 %vm462_vm9, %v383_v29 }
 0x17c   : > { %v546_v32 = vsel %vm466_vm8, %v544_v31, 0  ;;  %v869_v31 = vld [vmem:[#allocation9 + $0x8] sm:$0xff] }
 0x17d   : > { %555 = vmatpush.bf16.msra.mxu3 %v546_v32  ;;  %693 = vmatpush.bf16.msrb.mxu1 %v869_v31  ;;  %v868_v32 = vld [vmem:[#allocation9] sm:$0xff] }
 0x180   : > { %841 = vmatmul.msk.bf16.vlgmr.msra.gmra.mxu3 %vm462_vm9, %v383_v29 }
 0x181   : > { %694 = vmatpush.bf16.msrb.mxu1 %v868_v32 }
 0x1f8   : > { %v512_v34 = vpop.f32.mrf.mxu1 }
 0x1f9   : > { %v513_v35 = vadd.f32 %v512_v34, %v495_v33 }
 0x1fb   : > { %v516_v36 = vadd.f32 %v513_v35, %v1361_v1 }
 0x1fd   : > { %517 = vst.msk [vmem:[#allocation2] sm:$0xff] %vm392_vm0, %v516_v36 }
 0x200   : > { %v514_v37 = vpop.f32.mrf.mxu1 }
 0x203   : > { %v557_v38 = vpop.f32.mrf.mxu3 }
 0x204   : > { %v558_v39 = vadd.f32 %v557_v38, %v495_v33  ;;  %v1404_v40 = vld [vmem:[#allocation2] sm:$0xff]  ;;  %v622_v33 = vperm.slane %v381_v30, 0 }
 0x205   : > { %v565_v41 = vsel %vm392_vm0, %v1404_v40, 0.0  ;;  %v573_v43 = vmul.f32 %v1404_v40, %v1404_v40 }
 0x206   : > { %v561_v44 = vadd.f32 %v558_v39, %v1359_v0  ;;  %566 = vadd.xlane.f32.xlu0 %v565_v41 }
 0x207   : > { %v575_v45 = vsel %vm392_vm0, %v573_v43, 0.0 }
 0x208   : > { %562 = vst.msk [vmem:[#allocation2 + $0x8] sm:$0xff] %vm392_vm0, %v561_v44  ;;  %576 = vadd.xlane.f32.xlu2 %v575_v45 }
 0x20b   : > { %v559_v1 = vpop.f32.mrf.mxu3 }
 0x20f   : > { %v1413_v46 = vld [vmem:[#allocation2 + $0x8] sm:$0xff] }
 0x210   : > { %v568_v47 = vsel %vm392_vm0, %v1413_v46, 0.0  ;;  %v574_v48 = vmul.f32 %v1413_v46, %v1413_v46 }
 0x211   : > { %569 = vadd.xlane.f32.xlu1 %v568_v47 }
 0x212   : > { %v578_v49 = vsel %vm392_vm0, %v574_v48, 0.0 }
 0x213   : > { %579 = vadd.xlane.f32.xlu0 %v578_v49 }
 0x279   : > { %v567_v0 = vpop.xlane.xlu0 %566 }
 0x27a   : > { %v571_v50 = vmul.f32 %v567_v0, %v1373_v16 }
 0x27b   : > { %v577_v51 = vpop.xlane.xlu2 %576 }
 0x27c   : > { %v583_v52 = vmul.f32 %v571_v50, %v571_v50  ;;  %v581_v53 = vmul.f32 %v577_v51, %v1373_v16 }
 0x27e   : > { %v585_v54 = vsub.f32 %v581_v53, %v583_v52 }
 0x280   : > { %v587_v55 = vmax.f32 %v585_v54, 0.0 }
 0x282   : > { %v591_v57 = vadd.f32 1e-05, %v587_v55 }
 0x284   : > { %970 = vrsqrt.f32 %v591_v57  ;;  %v570_v59 = vpop.xlane.xlu1 %569  ;;  %vm599_vm10 = vweird.f32 %v591_v57 }
 0x285   : > { %v572_v60 = vmul.f32 %v570_v59, %v1373_v16 }
 0x286   : > { %v580_v61 = vpop.xlane.xlu0 %579 }
 0x287   : > { %v584_v62 = vmul.f32 %v572_v60, %v572_v60  ;;  %v582_v63 = vmul.f32 %v580_v61, %v1373_v16  ;;  %v589_v16 = vsub.f32 %v1404_v40, %v571_v50  ;;  %v590_v21 = vsub.f32 %v1413_v46, %v572_v60 }
 0x289   : > { %v586_v2 = vsub.f32 %v582_v63, %v584_v62 }
 0x28a   : > { %v971_v3 = vpop.eup %970 }
 0x28b   : > { %v594_v4 = vmul.f32 %v971_v3, %v591_v57  ;;  %v588_v5 = vmax.f32 %v586_v2, 0.0  ;;  %vm600_vm11 = vweird.f32 %v971_v3  ;;  %v671_v57 = vperm.slane %v381_v30, 1 }
 0x28c   : > { %vm601_vm12 = vmor %vm599_vm10, %vm600_vm11 }
 0x28d   : > { %v595_v6 = vmul.f32 %v971_v3, %v594_v4  ;;  %v592_v7 = vadd.f32 1e-05, %v588_v5 }
 0x28f   : > { %v596_v8 = vmul.f32 0.5, %v595_v6  ;;  %972 = vrsqrt.f32 %v592_v7  ;;  %vm609_vm14 = vweird.f32 %v592_v7 }
 0x291   : > { %v597_v9 = vsub.f32 1.5, %v596_v8 }
 0x293   : > { %v598_v11 = vmul.f32 %v971_v3, %v597_v9 }
 0x295   : > { %v973_v10 = vpop.eup %972  ;;  %v602_v14 = vsel %vm601_vm12, %v971_v3, %v598_v11 }
 0x296   : > { %v604_v12 = vmul.f32 %v973_v10, %v592_v7  ;;  %vm610_vm13 = vweird.f32 %v973_v10  ;;  %v613_v19 = vmul.f32 %v602_v14, %v589_v16 }
 0x297   : > { %vm611_vm15 = vmor %vm609_vm14, %vm610_vm13 }
 0x298   : > { %v605_v13 = vmul.f32 %v973_v10, %v604_v12  ;;  %v616_v24 = vmul.f32 %v615_v18, %v613_v19 }
 0x29a   : > { %v606_v15 = vmul.f32 0.5, %v605_v13  ;;  %v619_v27 = vadd.f32 %v618_v25, %v616_v24 }
 0x29c   : > { %v607_v17 = vsub.f32 1.5, %v606_v15 }
 0x29e   : > { %v608_v20 = vmul.f32 %v973_v10, %v607_v17 }
 0x2a0   : > { %v612_v22 = vsel %vm611_vm15, %v973_v10, %v608_v20 }
 0x2a1   : > { %v614_v23 = vmul.f32 %v612_v22, %v590_v21 }
 0x2a3   : > { %v617_v26 = vmul.f32 %v615_v18, %v614_v23 }
 0x2a5   : > { %v620_v28 = vadd.f32 %v618_v25, %v617_v26 }
 0x2a7   : > { %v621_v29 = vpack.c.bf16 %v620_v28, %v619_v27 }
 0x2a9   : > { %850 = vmatmul.msk.bf16.vlgmr.msrb.gmra.mxu0 %vm392_vm0, %v621_v29 }
 0x326   : > { %v647_v34 = vpop.f32.mrf.mxu0 }
 0x327   : > { %v648_v35 = vadd.f32 %v647_v34, %v622_v33 }
 0x329   : > { %v654_v36 = vmul.f32 %v648_v35, %v648_v35  ;;  %v652_v51 = vmul.f32 0.5, %v648_v35 }
 0x32b   : > { %v656_v37 = vmul.f32 %v654_v36, %v648_v35 }
 0x32d   : > { %v658_v42 = vmul.f32 0.044715, %v656_v37 }
 0x32e   : > { %v649_v38 = vpop.f32.mrf.mxu0 }
 0x32f   : > { %v660_v39 = vadd.f32 %v658_v42, %v648_v35  ;;  %v650_v41 = vadd.f32 %v649_v38, %v622_v33 }
 0x331   : > { %v655_v43 = vmul.f32 %v650_v41, %v650_v41  ;;  %v662_v44 = vmul.f32 0.7978846, %v660_v39  ;;  %v653_v52 = vmul.f32 0.5, %v650_v41 }
 0x333   : > { %v657_v45 = vmul.f32 %v655_v43, %v650_v41  ;;  %974 = vtanh.f32 %v662_v44 }
 0x335   : > { %v659_v1 = vmul.f32 0.044715, %v657_v45 }
 0x337   : > { %v661_v47 = vadd.f32 %v659_v1, %v650_v41 }
 0x339   : > { %v663_v48 = vmul.f32 0.7978846, %v661_v47  ;;  %v975_v49 = vpop.eup %974 }
 0x33a   : > { %v666_v0 = vadd.f32 1.0, %v975_v49 }
 0x33b   : > { %976 = vtanh.f32 %v663_v48 }
 0x33c   : > { %v668_v54 = vmul.f32 %v666_v0, %v652_v51 }
 0x341   : > { %v977_v50 = vpop.eup %976 }
 0x342   : > { %v667_v53 = vadd.f32 1.0, %v977_v50 }
 0x344   : > { %v669_v55 = vmul.f32 %v667_v53, %v653_v52 }
 0x346   : > { %v670_v56 = vpack.c.bf16 %v669_v55, %v668_v54 }
 0x348   : > { %859 = vmatmul.msk.bf16.vlgmr.msrb.gmra.mxu1 %vm392_vm0, %v670_v56 }
 0x3c5   : > { %v696_v58 = vpop.f32.mrf.mxu1 }
 0x3c6   : > { %v697_v59 = vadd.f32 %v696_v58, %v671_v57 }
 0x3c8   : > { %v701_v60 = vadd.f32 %v697_v59, %v1404_v40 }
 0x3ca   : > { %703 = vst.msk [vmem:[%s373_s25] sm:$0xff] %vm392_vm0, %v701_v60 }
 0x3cd   : > { %v698_v61 = vpop.f32.mrf.mxu1 }
 0x3ce   : > { %v699_v62 = vadd.f32 %v698_v61, %v671_v57 }
 0x3d0   : > { %v702_v63 = vadd.f32 %v699_v62, %v1413_v46 }
 0x3d2   : > { %704 = vst.msk [vmem:[%s373_s25 + $0x8] sm:$0xff] %vm392_vm0, %v702_v63 }
 0x3d3   : > { %1125 = shalt.err (!%p1122_p10)
}
 0x3d4   : > { %s1184_s24 = smov 128   ;;  %s1185_s13 = smov 8  }
 0x3d5   : > { %885 = dma.vmem_to_hbm [thread:$0]  (%p1313_p5), %s719_s11, 256, %s721_s16, %s706_s9, %s1184_s24, %s1184_s24, %s1185_s13  }
 0x3d6 PF: > { %p912_p11 = scmp.ge.s32.totalorder %s1172_s30, 2  ;;  %s735_s22 = sand.u32 1, %s1160_s27  }
 0x3d7   : > { %s736_s17 = scalar_lea.sflag [#allocation5], %s735_s22 }
 0x3d8   : > { %p902_p12 = pnand %p912_p11, %p1266_p6 }
 0x3da   : > { %p903_p13 = pneg %p902_p12 }
 0x3dc   : > { %1155 = dma.done.wait (%p903_p13), %s736_s17, 256  }
 0x3dd   : > { %1157 = vsyncadd (%p903_p13), %s736_s17, 4294967040  ;;  %p23_p0 = scmp.ge.s32.totalorder %s1299_s15, 6   ;;  %s1490_s27 = smov %s1164_s28 }
 0x3de   : > { %s1491_s28 = smov %s1168_s29  ;;  %s1492_s29 = smov %s1309_s21 }
 0x3df   : > { %s1493_s30 = smov %s1299_s15  ;;  %25 = sbr.rel (!%p23_p0) target bundleno = 10 (0xa), region = 109 }
 0x3e4   :  { %742 = vsyncpa [#allocation4], 1 }
 0x3e5   :  { %744 = vsyncpa [#allocation4 + $0x1], 1 }
 0x3e6   :  { %745 = vsyncpa [#allocation7], 1 }
 0x3e7   :  { %746 = vsyncpa [#allocation10], 1 }
 0x3e8   :  { %747 = vsyncpa [#allocation5], 1 }
 0x3e9   :  { %749 = vsyncpa [#allocation5 + $0x1], 1 }

</bundles_post_ra>
